<compile_context>
chip_gen: v7x
topology: tpu7x:2x2x1
jax: 0.10.0
libtpu: 0.0.40
codegen_flags: <defaults>
</compile_context>

<pallas_src>
import functools

import jax
import jax.numpy as jnp
from jax import lax
from jax.experimental import pallas as pl
from jax.experimental.pallas import tpu as pltpu


def _conv3d_bn_relu_kernel(x_ref, w_ref, scale_ref, bias_ref, o_ref, acc_ref,
                           *, stride, ksize, ho, wo):
    """Grid step = (sample n, output depth plane do, depth tap kd).

    x_ref:     (1, 1, H, W, Cin)      bf16 input depth-plane at d = do*s + kd
    w_ref:     (k, k, k, Cin, Cpad)   bf16 weights (Cout zero-padded to Cpad)
    scale_ref: (1, Cpad)              f32 folded BN scale
    bias_ref:  (1, Cpad)              f32 folded conv-bias + BN bias
    o_ref:     (1, 1, Ho*Wo, Cpad)    f32 flattened, lane-dense output plane
    acc_ref:   (Ho*Wo, Cpad)          f32 VMEM accumulator (persists over kd)
    """
    kd = pl.program_id(2)
    s = stride
    cin = x_ref.shape[-1]

    @pl.when(kd == 0)
    def _init():
        acc_ref[...] = jnp.zeros_like(acc_ref)

    if s == 1:
        def get_patch(kh, kw):
            # direct ref slice (no full-plane materialization), unit stride
            return x_ref[0, 0, kh:kh + ho, kw:kw + wo, :]
    else:
        plane = x_ref[0, 0]

        def get_patch(kh, kw):
            return plane[kh:kh + (ho - 1) * s + 1:s,
                         kw:kw + (wo - 1) * s + 1:s, :]

    # 9 shift-and-matmul taps for this kd plane; contraction over Cin on the
    # MXU with f32 accumulation directly into the VMEM scratch accumulator.
    for kh in range(ksize):
        for kw in range(ksize):
            p = get_patch(kh, kw).reshape(ho * wo, cin)        # (Ho*Wo, Cin) bf16
            wk = w_ref[kd, kh, kw]                             # (Cin, Cpad)  bf16
            acc_ref[...] += jnp.dot(p, wk, preferred_element_type=jnp.float32)

    @pl.when(kd == ksize - 1)
    def _finalize():
        # Fused BatchNorm (inference, pre-folded) + ReLU epilogue in f32.
        y = acc_ref[...] * scale_ref[...] + bias_ref[...]
        o_ref[0, 0] = jnp.maximum(y, 0.0).astype(o_ref.dtype)


def conv3d_block_forward(x, weight, conv_bias, gamma, beta,
                         running_mean, running_var, *, stride=1, eps=1e-5):
    """Equivalent of Conv3dBlock.forward (eval-mode BatchNorm).

    x:      (N, Cin, D, H, W)
    weight: (Cout, Cin, 3, 3, 3)
    returns (N, Cout, Do, Ho, Wo) with Do = (D-3)//stride + 1, etc.
    """
    N, Cin, D, H, W = x.shape
    Cout, _, k, _, _ = weight.shape
    s = int(stride)
    Do = (D - k) // s + 1
    Ho = (H - k) // s + 1
    Wo = (W - k) // s + 1
    assert Do > 0 and Ho > 0 and Wo > 0, "input spatial dims too small for k=3 conv"

    LANES = 128
    Cpad = ((Cout + LANES - 1) // LANES) * LANES      # lane-dense output channels

    # channels-last, bf16 compute inputs (f32 accumulation in-kernel)
    x_cl = jnp.transpose(x, (0, 2, 3, 4, 1)).astype(jnp.bfloat16)        # (N,D,H,W,Cin)
    w_cl = jnp.transpose(weight, (2, 3, 4, 1, 0)).astype(jnp.bfloat16)   # (k,k,k,Cin,Cout)
    w_cl = jnp.pad(w_cl, ((0, 0),) * 4 + ((0, Cpad - Cout),))            # pad Cout->Cpad

    # Fold conv bias + BatchNorm (inference) into per-channel scale / bias (f32).
    inv = gamma / jnp.sqrt(running_var + eps)
    scale = jnp.pad(inv, (0, Cpad - Cout)).reshape(1, Cpad).astype(jnp.float32)
    bias = jnp.pad((conv_bias - running_mean) * inv + beta,
                   (0, Cpad - Cout)).reshape(1, Cpad).astype(jnp.float32)

    # Per-chip VMEM budget: generous on v5e/v6e (128 MiB), bounded on v7x (64 MiB).
    try:
        vmem_cap = int(pltpu.get_tpu_info().vmem_capacity_bytes)
    except Exception:
        vmem_cap = 64 * 1024 * 1024
    vmem_limit = min((vmem_cap * 3) // 4, 100 * 1024 * 1024)

    flops = 2 * N * Do * Ho * Wo * Cpad * Cin * (k ** 3)
    bytes_accessed = (k * x_cl.size * 2            # each D-plane read ~k times
                      + w_cl.size * 2
                      + N * Do * Ho * Wo * Cpad * 4)

    out_p = pl.pallas_call(
        functools.partial(_conv3d_bn_relu_kernel,
                          stride=s, ksize=k, ho=Ho, wo=Wo),
        out_shape=jax.ShapeDtypeStruct((N, Do, Ho * Wo, Cpad), jnp.float32),
        grid=(N, Do, k),
        in_specs=[
            # one input depth-plane per step: d = do*s + kd (block size 1 on D)
            pl.BlockSpec((1, 1, H, W, Cin),
                         lambda n, do, kd: (n, do * s + kd, 0, 0, 0)),
            # weights resident in VMEM for the whole grid
            pl.BlockSpec((k, k, k, Cin, Cpad),
                         lambda n, do, kd: (0, 0, 0, 0, 0)),
            pl.BlockSpec((1, Cpad), lambda n, do, kd: (0, 0)),
            pl.BlockSpec((1, Cpad), lambda n, do, kd: (0, 0)),
        ],
        out_specs=pl.BlockSpec((1, 1, Ho * Wo, Cpad),
                               lambda n, do, kd: (n, do, 0, 0)),
        scratch_shapes=[pltpu.VMEM((Ho * Wo, Cpad), jnp.float32)],
        compiler_params=pltpu.CompilerParams(
            dimension_semantics=("parallel", "parallel", "arbitrary"),
            vmem_limit_bytes=int(vmem_limit),
        ),
        cost_estimate=pl.CostEstimate(
            flops=int(flops), transcendentals=0,
            bytes_accessed=int(bytes_accessed)),
    )(x_cl, w_cl, scale, bias)

    # Un-pad channels, un-flatten spatial dims, back to PyTorch NCDHW.
    out = out_p[:, :, :, :Cout].reshape(N, Do, Ho, Wo, Cout)
    return jnp.transpose(out, (0, 4, 1, 2, 3))


def _reference_forward(x, weight, conv_bias, gamma, beta, mean, var, stride, eps):
    # Reference uses the same bf16 inputs / f32 accumulation as the kernel.
    y = lax.conv_general_dilated(
        x.astype(jnp.bfloat16), weight.astype(jnp.bfloat16),
        window_strides=(stride, stride, stride),
        padding="VALID",
        dimension_numbers=("NCDHW", "OIDHW", "NCDHW"),
        preferred_element_type=jnp.float32)
    c = (1, -1, 1, 1, 1)
    y = y + conv_bias.reshape(c)
    y = (y - mean.reshape(c)) / jnp.sqrt(var.reshape(c) + eps)
    y = y * gamma.reshape(c) + beta.reshape(c)
    return jnp.maximum(y, 0.0)


if __name__ == "__main__":
    key = jax.random.PRNGKey(0)
    k_x, k_w, k_b, k_g, k_beta, k_m, k_v = jax.random.split(key, 7)

    N, Cin, Cout = 2, 4, 8
    D = H = W = 10
    stride = 1
    eps = 1e-5

    x = jax.random.normal(k_x, (N, Cin, D, H, W), dtype=jnp.float32)
    weight = jax.random.normal(k_w, (Cout, Cin, 3, 3, 3), dtype=jnp.float32) * 0.1
    conv_bias = jax.random.normal(k_b, (Cout,), dtype=jnp.float32) * 0.1
    gamma = jax.random.uniform(k_g, (Cout,), minval=0.5, maxval=1.5, dtype=jnp.float32)
    beta = jax.random.normal(k_beta, (Cout,), dtype=jnp.float32) * 0.1
    running_mean = jax.random.normal(k_m, (Cout,), dtype=jnp.float32) * 0.1
    running_var = jax.random.uniform(k_v, (Cout,), minval=0.5, maxval=1.5,
                                     dtype=jnp.float32)

    y = conv3d_block_forward(x, weight, conv_bias, gamma, beta,
                             running_mean, running_var, stride=stride, eps=eps)
    y = jax.block_until_ready(y)

    y_ref = _reference_forward(x, weight, conv_bias, gamma, beta,
                               running_mean, running_var, stride, eps)
    assert y.shape == y_ref.shape, (y.shape, y_ref.shape)
    max_err = float(jnp.max(jnp.abs(y - y_ref)))
    # bf16 conv inputs -> looser tolerance than a pure-f32 comparison
    assert jnp.allclose(y, y_ref, atol=2e-2, rtol=2e-2), f"max abs err {max_err}"

    print("KERNEL_OK")
</pallas_src>

<mosaic_0001>
module attributes {stable_mosaic.version = 11 : i64} {
  func.func @_conv3d_bn_relu_kernel(%arg0: i32, %arg1: i32, %arg2: i32, %arg3: memref<1x1x10x10x4xbf16, #tpu.memory_space<vmem>>, %arg4: memref<3x3x3x4x128xbf16, #tpu.memory_space<vmem>>, %arg5: memref<1x128xf32, #tpu.memory_space<vmem>>, %arg6: memref<1x128xf32, #tpu.memory_space<vmem>>, %arg7: memref<1x1x64x128xf32, #tpu.memory_space<vmem>>, %arg8: memref<64x128xf32, #tpu.memory_space<vmem>>) attributes {dimension_semantics = [#tpu.dimension_semantics<parallel>, #tpu.dimension_semantics<parallel>, #tpu.dimension_semantics<arbitrary>], iteration_bounds = array<i64: 2, 8, 3>, scalar_prefetch = 0 : i64, scratch_operands = 1 : i64, tpu.core_type = #tpu.core_type<tc>, window_params = [{transform_indices = @transform_0, window_bounds = array<i64: 1, 1, 10, 10, 4>}, {pipeline_mode = #tpu.pipeline_mode<synchronous>, transform_indices = @transform_1, window_bounds = array<i64: 3, 3, 3, 4, 128>}, {pipeline_mode = #tpu.pipeline_mode<synchronous>, transform_indices = @transform_2, window_bounds = array<i64: 1, 128>}, {pipeline_mode = #tpu.pipeline_mode<synchronous>, transform_indices = @transform_3, window_bounds = array<i64: 1, 128>}, {transform_indices = @transform_4, window_bounds = array<i64: 1, 1, 64, 128>}]} {
    %c0_i32 = arith.constant 0 : i32
    %0 = arith.cmpi eq, %arg2, %c0_i32 : i32
    %1 = arith.extui %0 : i1 to i32
    %c0_i32_0 = arith.constant 0 : i32
    %2 = arith.cmpi ne, %1, %c0_i32_0 : i32
    scf.if %2 {
      %cst_124 = arith.constant 0.000000e+00 : f32
      %96 = vector.broadcast %cst_124 : f32 to vector<64x128xf32>
      %c0_125 = arith.constant 0 : index
      %c0_126 = arith.constant 0 : index
      %97 = vector.load %arg8[%c0_125, %c0_126] : memref<64x128xf32, #tpu.memory_space<vmem>>, vector<64x128xf32>
      tpu.vector_store %arg8[%c0_125, %c0_126], %96 {strides = array<i32>} : memref<64x128xf32, #tpu.memory_space<vmem>>, vector<64x128xf32>,
    } else {
    }
    %c0 = arith.constant 0 : index
    %c0_1 = arith.constant 0 : index
    %c0_2 = arith.constant 0 : index
    %c0_3 = arith.constant 0 : index
    %c0_4 = arith.constant 0 : index
    %3 = vector.load %arg3[%c0, %c0_1, %c0_2, %c0_3, %c0_4] : memref<1x1x10x10x4xbf16, #tpu.memory_space<vmem>>, vector<1x1x8x8x4xbf16>
    %4 = vector.shape_cast %3 : vector<1x1x8x8x4xbf16> to vector<8x8x4xbf16>
    %5 = vector.shape_cast %4 : vector<8x8x4xbf16> to vector<64x4xbf16>
    %6 = arith.index_cast %arg2 : i32 to index
    %c0_5 = arith.constant 0 : index
    %c0_6 = arith.constant 0 : index
    %c0_7 = arith.constant 0 : index
    %c0_8 = arith.constant 0 : index
    %7 = vector.load %arg4[%6, %c0_5, %c0_6, %c0_7, %c0_8] : memref<3x3x3x4x128xbf16, #tpu.memory_space<vmem>>, vector<1x1x1x4x128xbf16>
    %8 = vector.shape_cast %7 : vector<1x1x1x4x128xbf16> to vector<4x128xbf16>
    %c0_9 = arith.constant 0 : index
    %c0_10 = arith.constant 0 : index
    %9 = vector.load %arg8[%c0_9, %c0_10] : memref<64x128xf32, #tpu.memory_space<vmem>>, vector<64x128xf32>
    %cst = arith.constant dense<0.000000e+00> : vector<64x128xf32>
    %10 = tpu.matmul %5, %8, %cst {dimension_numbers = #tpu.dot_dimension_numbers<[1], [0], [0], [1], [0, 0, 1, 1], [], []>} : vector<64x4xbf16>, vector<4x128xbf16>, vector<64x128xf32> -> vector<64x128xf32>
    %11 = arith.addf %9, %10 : vector<64x128xf32>
    %c0_11 = arith.constant 0 : index
    %c0_12 = arith.constant 0 : index
    %12 = vector.load %arg8[%c0_11, %c0_12] : memref<64x128xf32, #tpu.memory_space<vmem>>, vector<64x128xf32>
    tpu.vector_store %arg8[%c0_11, %c0_12], %11 {strides = array<i32>} : memref<64x128xf32, #tpu.memory_space<vmem>>, vector<64x128xf32>,
    %c0_13 = arith.constant 0 : index
    %c0_14 = arith.constant 0 : index
    %c0_15 = arith.constant 0 : index
    %c1 = arith.constant 1 : index
    %c0_16 = arith.constant 0 : index
    %13 = vector.load %arg3[%c0_13, %c0_14, %c0_15, %c1, %c0_16] : memref<1x1x10x10x4xbf16, #tpu.memory_space<vmem>>, vector<1x1x8x8x4xbf16>
    %14 = vector.shape_cast %13 : vector<1x1x8x8x4xbf16> to vector<8x8x4xbf16>
    %15 = vector.shape_cast %14 : vector<8x8x4xbf16> to vector<64x4xbf16>
    %16 = arith.index_cast %arg2 : i32 to index
    %c0_17 = arith.constant 0 : index
    %c1_18 = arith.constant 1 : index
    %c0_19 = arith.constant 0 : index
    %c0_20 = arith.constant 0 : index
    %17 = vector.load %arg4[%16, %c0_17, %c1_18, %c0_19, %c0_20] : memref<3x3x3x4x128xbf16, #tpu.memory_space<vmem>>, vector<1x1x1x4x128xbf16>
    %18 = vector.shape_cast %17 : vector<1x1x1x4x128xbf16> to vector<4x128xbf16>
    %c0_21 = arith.constant 0 : index
    %c0_22 = arith.constant 0 : index
    %19 = vector.load %arg8[%c0_21, %c0_22] : memref<64x128xf32, #tpu.memory_space<vmem>>, vector<64x128xf32>
    %cst_23 = arith.constant dense<0.000000e+00> : vector<64x128xf32>
    %20 = tpu.matmul %15, %18, %cst_23 {dimension_numbers = #tpu.dot_dimension_numbers<[1], [0], [0], [1], [0, 0, 1, 1], [], []>} : vector<64x4xbf16>, vector<4x128xbf16>, vector<64x128xf32> -> vector<64x128xf32>
    %21 = arith.addf %19, %20 : vector<64x128xf32>
    %c0_24 = arith.constant 0 : index
    %c0_25 = arith.constant 0 : index
    %22 = vector.load %arg8[%c0_24, %c0_25] : memref<64x128xf32, #tpu.memory_space<vmem>>, vector<64x128xf32>
    tpu.vector_store %arg8[%c0_24, %c0_25], %21 {strides = array<i32>} : memref<64x128xf32, #tpu.memory_space<vmem>>, vector<64x128xf32>,
    %c0_26 = arith.constant 0 : index
    %c0_27 = arith.constant 0 : index
    %c0_28 = arith.constant 0 : index
    %c2 = arith.constant 2 : index
    %c0_29 = arith.constant 0 : index
    %23 = vector.load %arg3[%c0_26, %c0_27, %c0_28, %c2, %c0_29] : memref<1x1x10x10x4xbf16, #tpu.memory_space<vmem>>, vector<1x1x8x8x4xbf16>
    %24 = vector.shape_cast %23 : vector<1x1x8x8x4xbf16> to vector<8x8x4xbf16>
    %25 = vector.shape_cast %24 : vector<8x8x4xbf16> to vector<64x4xbf16>
    %26 = arith.index_cast %arg2 : i32 to index
    %c0_30 = arith.constant 0 : index
    %c2_31 = arith.constant 2 : index
    %c0_32 = arith.constant 0 : index
    %c0_33 = arith.constant 0 : index
    %27 = vector.load %arg4[%26, %c0_30, %c2_31, %c0_32, %c0_33] : memref<3x3x3x4x128xbf16, #tpu.memory_space<vmem>>, vector<1x1x1x4x128xbf16>
    %28 = vector.shape_cast %27 : vector<1x1x1x4x128xbf16> to vector<4x128xbf16>
    %c0_34 = arith.constant 0 : index
    %c0_35 = arith.constant 0 : index
    %29 = vector.load %arg8[%c0_34, %c0_35] : memref<64x128xf32, #tpu.memory_space<vmem>>, vector<64x128xf32>
    %cst_36 = arith.constant dense<0.000000e+00> : vector<64x128xf32>
    %30 = tpu.matmul %25, %28, %cst_36 {dimension_numbers = #tpu.dot_dimension_numbers<[1], [0], [0], [1], [0, 0, 1, 1], [], []>} : vector<64x4xbf16>, vector<4x128xbf16>, vector<64x128xf32> -> vector<64x128xf32>
    %31 = arith.addf %29, %30 : vector<64x128xf32>
    %c0_37 = arith.constant 0 : index
    %c0_38 = arith.constant 0 : index
    %32 = vector.load %arg8[%c0_37, %c0_38] : memref<64x128xf32, #tpu.memory_space<vmem>>, vector<64x128xf32>
    tpu.vector_store %arg8[%c0_37, %c0_38], %31 {strides = array<i32>} : memref<64x128xf32, #tpu.memory_space<vmem>>, vector<64x128xf32>,
    %c0_39 = arith.constant 0 : index
    %c0_40 = arith.constant 0 : index
    %c1_41 = arith.constant 1 : index
    %c0_42 = arith.constant 0 : index
    %c0_43 = arith.constant 0 : index
    %33 = vector.load %arg3[%c0_39, %c0_40, %c1_41, %c0_42, %c0_43] : memref<1x1x10x10x4xbf16, #tpu.memory_space<vmem>>, vector<1x1x8x8x4xbf16>
    %34 = vector.shape_cast %33 : vector<1x1x8x8x4xbf16> to vector<8x8x4xbf16>
    %35 = vector.shape_cast %34 : vector<8x8x4xbf16> to vector<64x4xbf16>
    %36 = arith.index_cast %arg2 : i32 to index
    %c1_44 = arith.constant 1 : index
    %c0_45 = arith.constant 0 : index
    %c0_46 = arith.constant 0 : index
    %c0_47 = arith.constant 0 : index
    %37 = vector.load %arg4[%36, %c1_44, %c0_45, %c0_46, %c0_47] : memref<3x3x3x4x128xbf16, #tpu.memory_space<vmem>>, vector<1x1x1x4x128xbf16>
    %38 = vector.shape_cast %37 : vector<1x1x1x4x128xbf16> to vector<4x128xbf16>
    %c0_48 = arith.constant 0 : index
    %c0_49 = arith.constant 0 : index
    %39 = vector.load %arg8[%c0_48, %c0_49] : memref<64x128xf32, #tpu.memory_space<vmem>>, vector<64x128xf32>
    %cst_50 = arith.constant dense<0.000000e+00> : vector<64x128xf32>
    %40 = tpu.matmul %35, %38, %cst_50 {dimension_numbers = #tpu.dot_dimension_numbers<[1], [0], [0], [1], [0, 0, 1, 1], [], []>} : vector<64x4xbf16>, vector<4x128xbf16>, vector<64x128xf32> -> vector<64x128xf32>
    %41 = arith.addf %39, %40 : vector<64x128xf32>
    %c0_51 = arith.constant 0 : index
    %c0_52 = arith.constant 0 : index
    %42 = vector.load %arg8[%c0_51, %c0_52] : memref<64x128xf32, #tpu.memory_space<vmem>>, vector<64x128xf32>
    tpu.vector_store %arg8[%c0_51, %c0_52], %41 {strides = array<i32>} : memref<64x128xf32, #tpu.memory_space<vmem>>, vector<64x128xf32>,
    %c0_53 = arith.constant 0 : index
    %c0_54 = arith.constant 0 : index
    %c1_55 = arith.constant 1 : index
    %c1_56 = arith.constant 1 : index
    %c0_57 = arith.constant 0 : index
    %43 = vector.load %arg3[%c0_53, %c0_54, %c1_55, %c1_56, %c0_57] : memref<1x1x10x10x4xbf16, #tpu.memory_space<vmem>>, vector<1x1x8x8x4xbf16>
    %44 = vector.shape_cast %43 : vector<1x1x8x8x4xbf16> to vector<8x8x4xbf16>
    %45 = vector.shape_cast %44 : vector<8x8x4xbf16> to vector<64x4xbf16>
    %46 = arith.index_cast %arg2 : i32 to index
    %c1_58 = arith.constant 1 : index
    %c1_59 = arith.constant 1 : index
    %c0_60 = arith.constant 0 : index
    %c0_61 = arith.constant 0 : index
    %47 = vector.load %arg4[%46, %c1_58, %c1_59, %c0_60, %c0_61] : memref<3x3x3x4x128xbf16, #tpu.memory_space<vmem>>, vector<1x1x1x4x128xbf16>
    %48 = vector.shape_cast %47 : vector<1x1x1x4x128xbf16> to vector<4x128xbf16>
    %c0_62 = arith.constant 0 : index
    %c0_63 = arith.constant 0 : index
    %49 = vector.load %arg8[%c0_62, %c0_63] : memref<64x128xf32, #tpu.memory_space<vmem>>, vector<64x128xf32>
    %cst_64 = arith.constant dense<0.000000e+00> : vector<64x128xf32>
    %50 = tpu.matmul %45, %48, %cst_64 {dimension_numbers = #tpu.dot_dimension_numbers<[1], [0], [0], [1], [0, 0, 1, 1], [], []>} : vector<64x4xbf16>, vector<4x128xbf16>, vector<64x128xf32> -> vector<64x128xf32>
    %51 = arith.addf %49, %50 : vector<64x128xf32>
    %c0_65 = arith.constant 0 : index
    %c0_66 = arith.constant 0 : index
    %52 = vector.load %arg8[%c0_65, %c0_66] : memref<64x128xf32, #tpu.memory_space<vmem>>, vector<64x128xf32>
    tpu.vector_store %arg8[%c0_65, %c0_66], %51 {strides = array<i32>} : memref<64x128xf32, #tpu.memory_space<vmem>>, vector<64x128xf32>,
    %c0_67 = arith.constant 0 : index
    %c0_68 = arith.constant 0 : index
    %c1_69 = arith.constant 1 : index
    %c2_70 = arith.constant 2 : index
    %c0_71 = arith.constant 0 : index
    %53 = vector.load %arg3[%c0_67, %c0_68, %c1_69, %c2_70, %c0_71] : memref<1x1x10x10x4xbf16, #tpu.memory_space<vmem>>, vector<1x1x8x8x4xbf16>
    %54 = vector.shape_cast %53 : vector<1x1x8x8x4xbf16> to vector<8x8x4xbf16>
    %55 = vector.shape_cast %54 : vector<8x8x4xbf16> to vector<64x4xbf16>
    %56 = arith.index_cast %arg2 : i32 to index
    %c1_72 = arith.constant 1 : index
    %c2_73 = arith.constant 2 : index
    %c0_74 = arith.constant 0 : index
    %c0_75 = arith.constant 0 : index
    %57 = vector.load %arg4[%56, %c1_72, %c2_73, %c0_74, %c0_75] : memref<3x3x3x4x128xbf16, #tpu.memory_space<vmem>>, vector<1x1x1x4x128xbf16>
    %58 = vector.shape_cast %57 : vector<1x1x1x4x128xbf16> to vector<4x128xbf16>
    %c0_76 = arith.constant 0 : index
    %c0_77 = arith.constant 0 : index
    %59 = vector.load %arg8[%c0_76, %c0_77] : memref<64x128xf32, #tpu.memory_space<vmem>>, vector<64x128xf32>
    %cst_78 = arith.constant dense<0.000000e+00> : vector<64x128xf32>
    %60 = tpu.matmul %55, %58, %cst_78 {dimension_numbers = #tpu.dot_dimension_numbers<[1], [0], [0], [1], [0, 0, 1, 1], [], []>} : vector<64x4xbf16>, vector<4x128xbf16>, vector<64x128xf32> -> vector<64x128xf32>
    %61 = arith.addf %59, %60 : vector<64x128xf32>
    %c0_79 = arith.constant 0 : index
    %c0_80 = arith.constant 0 : index
    %62 = vector.load %arg8[%c0_79, %c0_80] : memref<64x128xf32, #tpu.memory_space<vmem>>, vector<64x128xf32>
    tpu.vector_store %arg8[%c0_79, %c0_80], %61 {strides = array<i32>} : memref<64x128xf32, #tpu.memory_space<vmem>>, vector<64x128xf32>,
    %c0_81 = arith.constant 0 : index
    %c0_82 = arith.constant 0 : index
    %c2_83 = arith.constant 2 : index
    %c0_84 = arith.constant 0 : index
    %c0_85 = arith.constant 0 : index
    %63 = vector.load %arg3[%c0_81, %c0_82, %c2_83, %c0_84, %c0_85] : memref<1x1x10x10x4xbf16, #tpu.memory_space<vmem>>, vector<1x1x8x8x4xbf16>
    %64 = vector.shape_cast %63 : vector<1x1x8x8x4xbf16> to vector<8x8x4xbf16>
    %65 = vector.shape_cast %64 : vector<8x8x4xbf16> to vector<64x4xbf16>
    %66 = arith.index_cast %arg2 : i32 to index
    %c2_86 = arith.constant 2 : index
    %c0_87 = arith.constant 0 : index
    %c0_88 = arith.constant 0 : index
    %c0_89 = arith.constant 0 : index
    %67 = vector.load %arg4[%66, %c2_86, %c0_87, %c0_88, %c0_89] : memref<3x3x3x4x128xbf16, #tpu.memory_space<vmem>>, vector<1x1x1x4x128xbf16>
    %68 = vector.shape_cast %67 : vector<1x1x1x4x128xbf16> to vector<4x128xbf16>
    %c0_90 = arith.constant 0 : index
    %c0_91 = arith.constant 0 : index
    %69 = vector.load %arg8[%c0_90, %c0_91] : memref<64x128xf32, #tpu.memory_space<vmem>>, vector<64x128xf32>
    %cst_92 = arith.constant dense<0.000000e+00> : vector<64x128xf32>
    %70 = tpu.matmul %65, %68, %cst_92 {dimension_numbers = #tpu.dot_dimension_numbers<[1], [0], [0], [1], [0, 0, 1, 1], [], []>} : vector<64x4xbf16>, vector<4x128xbf16>, vector<64x128xf32> -> vector<64x128xf32>
    %71 = arith.addf %69, %70 : vector<64x128xf32>
    %c0_93 = arith.constant 0 : index
    %c0_94 = arith.constant 0 : index
    %72 = vector.load %arg8[%c0_93, %c0_94] : memref<64x128xf32, #tpu.memory_space<vmem>>, vector<64x128xf32>
    tpu.vector_store %arg8[%c0_93, %c0_94], %71 {strides = array<i32>} : memref<64x128xf32, #tpu.memory_space<vmem>>, vector<64x128xf32>,
    %c0_95 = arith.constant 0 : index
    %c0_96 = arith.constant 0 : index
    %c2_97 = arith.constant 2 : index
    %c1_98 = arith.constant 1 : index
    %c0_99 = arith.constant 0 : index
    %73 = vector.load %arg3[%c0_95, %c0_96, %c2_97, %c1_98, %c0_99] : memref<1x1x10x10x4xbf16, #tpu.memory_space<vmem>>, vector<1x1x8x8x4xbf16>
    %74 = vector.shape_cast %73 : vector<1x1x8x8x4xbf16> to vector<8x8x4xbf16>
    %75 = vector.shape_cast %74 : vector<8x8x4xbf16> to vector<64x4xbf16>
    %76 = arith.index_cast %arg2 : i32 to index
    %c2_100 = arith.constant 2 : index
    %c1_101 = arith.constant 1 : index
    %c0_102 = arith.constant 0 : index
    %c0_103 = arith.constant 0 : index
    %77 = vector.load %arg4[%76, %c2_100, %c1_101, %c0_102, %c0_103] : memref<3x3x3x4x128xbf16, #tpu.memory_space<vmem>>, vector<1x1x1x4x128xbf16>
    %78 = vector.shape_cast %77 : vector<1x1x1x4x128xbf16> to vector<4x128xbf16>
    %c0_104 = arith.constant 0 : index
    %c0_105 = arith.constant 0 : index
    %79 = vector.load %arg8[%c0_104, %c0_105] : memref<64x128xf32, #tpu.memory_space<vmem>>, vector<64x128xf32>
    %cst_106 = arith.constant dense<0.000000e+00> : vector<64x128xf32>
    %80 = tpu.matmul %75, %78, %cst_106 {dimension_numbers = #tpu.dot_dimension_numbers<[1], [0], [0], [1], [0, 0, 1, 1], [], []>} : vector<64x4xbf16>, vector<4x128xbf16>, vector<64x128xf32> -> vector<64x128xf32>
    %81 = arith.addf %79, %80 : vector<64x128xf32>
    %c0_107 = arith.constant 0 : index
    %c0_108 = arith.constant 0 : index
    %82 = vector.load %arg8[%c0_107, %c0_108] : memref<64x128xf32, #tpu.memory_space<vmem>>, vector<64x128xf32>
    tpu.vector_store %arg8[%c0_107, %c0_108], %81 {strides = array<i32>} : memref<64x128xf32, #tpu.memory_space<vmem>>, vector<64x128xf32>,
    %c0_109 = arith.constant 0 : index
    %c0_110 = arith.constant 0 : index
    %c2_111 = arith.constant 2 : index
    %c2_112 = arith.constant 2 : index
    %c0_113 = arith.constant 0 : index
    %83 = vector.load %arg3[%c0_109, %c0_110, %c2_111, %c2_112, %c0_113] : memref<1x1x10x10x4xbf16, #tpu.memory_space<vmem>>, vector<1x1x8x8x4xbf16>
    %84 = vector.shape_cast %83 : vector<1x1x8x8x4xbf16> to vector<8x8x4xbf16>
    %85 = vector.shape_cast %84 : vector<8x8x4xbf16> to vector<64x4xbf16>
    %86 = arith.index_cast %arg2 : i32 to index
    %c2_114 = arith.constant 2 : index
    %c2_115 = arith.constant 2 : index
    %c0_116 = arith.constant 0 : index
    %c0_117 = arith.constant 0 : index
    %87 = vector.load %arg4[%86, %c2_114, %c2_115, %c0_116, %c0_117] : memref<3x3x3x4x128xbf16, #tpu.memory_space<vmem>>, vector<1x1x1x4x128xbf16>
    %88 = vector.shape_cast %87 : vector<1x1x1x4x128xbf16> to vector<4x128xbf16>
    %c0_118 = arith.constant 0 : index
    %c0_119 = arith.constant 0 : index
    %89 = vector.load %arg8[%c0_118, %c0_119] : memref<64x128xf32, #tpu.memory_space<vmem>>, vector<64x128xf32>
    %cst_120 = arith.constant dense<0.000000e+00> : vector<64x128xf32>
    %90 = tpu.matmul %85, %88, %cst_120 {dimension_numbers = #tpu.dot_dimension_numbers<[1], [0], [0], [1], [0, 0, 1, 1], [], []>} : vector<64x4xbf16>, vector<4x128xbf16>, vector<64x128xf32> -> vector<64x128xf32>
    %91 = arith.addf %89, %90 : vector<64x128xf32>
    %c0_121 = arith.constant 0 : index
    %c0_122 = arith.constant 0 : index
    %92 = vector.load %arg8[%c0_121, %c0_122] : memref<64x128xf32, #tpu.memory_space<vmem>>, vector<64x128xf32>
    tpu.vector_store %arg8[%c0_121, %c0_122], %91 {strides = array<i32>} : memref<64x128xf32, #tpu.memory_space<vmem>>, vector<64x128xf32>,
    %c2_i32 = arith.constant 2 : i32
    %93 = arith.cmpi eq, %arg2, %c2_i32 : i32
    %94 = arith.extui %93 : i1 to i32
    %c0_i32_123 = arith.constant 0 : i32
    %95 = arith.cmpi ne, %94, %c0_i32_123 : i32
    scf.if %95 {
      %c0_124 = arith.constant 0 : index
      %c0_125 = arith.constant 0 : index
      %96 = vector.load %arg8[%c0_124, %c0_125] : memref<64x128xf32, #tpu.memory_space<vmem>>, vector<64x128xf32>
      %c0_126 = arith.constant 0 : index
      %c0_127 = arith.constant 0 : index
      %97 = vector.load %arg5[%c0_126, %c0_127] : memref<1x128xf32, #tpu.memory_space<vmem>>, vector<1x128xf32>
      %98 = vector.broadcast %97 : vector<1x128xf32> to vector<64x128xf32>
      %99 = arith.mulf %96, %98 : vector<64x128xf32>
      %c0_128 = arith.constant 0 : index
      %c0_129 = arith.constant 0 : index
      %100 = vector.load %arg6[%c0_128, %c0_129] : memref<1x128xf32, #tpu.memory_space<vmem>>, vector<1x128xf32>
      %101 = vector.broadcast %100 : vector<1x128xf32> to vector<64x128xf32>
      %102 = arith.addf %99, %101 : vector<64x128xf32>
      %cst_130 = arith.constant 0.000000e+00 : f32
      %103 = vector.broadcast %cst_130 : f32 to vector<64x128xf32>
      %104 = arith.maximumf %102, %103 : vector<64x128xf32>
      %c0_131 = arith.constant 0 : index
      %c0_132 = arith.constant 0 : index
      %c0_133 = arith.constant 0 : index
      %c0_134 = arith.constant 0 : index
      %105 = vector.load %arg7[%c0_131, %c0_132, %c0_133, %c0_134] : memref<1x1x64x128xf32, #tpu.memory_space<vmem>>, vector<1x1x64x128xf32>
      %106 = vector.shape_cast %105 : vector<1x1x64x128xf32> to vector<64x128xf32>
      %107 = vector.shape_cast %104 : vector<64x128xf32> to vector<1x1x64x128xf32>
      tpu.vector_store %arg7[%c0_131, %c0_132, %c0_133, %c0_134], %107 {strides = array<i32>} : memref<1x1x64x128xf32, #tpu.memory_space<vmem>>, vector<1x1x64x128xf32>,
    } else {
    }
    return
  }
  func.func @transform_0(%arg0: i32, %arg1: i32, %arg2: i32) -> (i32, i32, i32, i32, i32) {
    %c1_i32 = arith.constant 1 : i32
    %0 = arith.muli %arg1, %c1_i32 : i32
    %1 = arith.addi %0, %arg2 : i32
    %c0_i32 = arith.constant 0 : i32
    %c0_i32_0 = arith.constant 0 : i32
    %c0_i32_1 = arith.constant 0 : i32
    %c0_i32_2 = arith.constant 0 : i32
    return %arg0, %1, %c0_i32, %c0_i32_0, %c0_i32_1 : i32, i32, i32, i32, i32
  }
  func.func @transform_1(%arg0: i32, %arg1: i32, %arg2: i32) -> (i32, i32, i32, i32, i32) {
    %c0_i32 = arith.constant 0 : i32
    %c0_i32_0 = arith.constant 0 : i32
    %c0_i32_1 = arith.constant 0 : i32
    %c0_i32_2 = arith.constant 0 : i32
    %c0_i32_3 = arith.constant 0 : i32
    %c0_i32_4 = arith.constant 0 : i32
    return %c0_i32, %c0_i32_0, %c0_i32_1, %c0_i32_2, %c0_i32_3 : i32, i32, i32, i32, i32
  }
  func.func @transform_2(%arg0: i32, %arg1: i32, %arg2: i32) -> (i32, i32) {
    %c0_i32 = arith.constant 0 : i32
    %c0_i32_0 = arith.constant 0 : i32
    %c0_i32_1 = arith.constant 0 : i32
    return %c0_i32, %c0_i32_0 : i32, i32
  }
  func.func @transform_3(%arg0: i32, %arg1: i32, %arg2: i32) -> (i32, i32) {
    %c0_i32 = arith.constant 0 : i32
    %c0_i32_0 = arith.constant 0 : i32
    %c0_i32_1 = arith.constant 0 : i32
    return %c0_i32, %c0_i32_0 : i32, i32
  }
  func.func @transform_4(%arg0: i32, %arg1: i32, %arg2: i32) -> (i32, i32, i32, i32) {
    %c0_i32 = arith.constant 0 : i32
    %c0_i32_0 = arith.constant 0 : i32
    %c0_i32_1 = arith.constant 0 : i32
    return %arg0, %arg1, %c0_i32, %c0_i32_0 : i32, i32, i32, i32
  }
}

</mosaic_0001>

<bundles_post_ra>
// kernel: tpu_custom_call.1
= control target key start
LH: loop header
LB: loop body
LE: loop exit
PB: predicated region body
PF: predicated region fallthrough
CT: control target
= control target key end

     0   :  { %9 = vsyncpa [#allocation4], 0  ;;  %s3351_s0 = inlined_call_operand.vmem [shape: bf16[2,10,10,10,4], index: 0, kind: input, shape index: {}]   ;;  %s3352_s1 = inlined_call_operand.vmem [shape: bf16[3,3,3,4,128], index: 1, kind: input, shape index: {}]   ;;  %s3353_s2 = inlined_call_operand.vmem [shape: f32[1,128], index: 2, kind: input, shape index: {}]   ;;  %s3354_s3 = inlined_call_operand.vmem [shape: f32[1,128], index: 3, kind: input, shape index: {}]   ;;  %s3355_s4 = inlined_call_operand.hbm [shape: f32[2,8,64,128], index: 4, kind: output, shape index: {}]  }
   0x1   :  { %11 = vsyncpa [#allocation4 + $0x1], 0  ;;  %s2871_s15 = smov 0   ;;  %s2873_s16 = smov 0  }
   0x2   :  { %s2875_s17 = smov 0   ;;  %s2877_s18 = smov 0  }
   0x3   :  { %s2879_s19 = smov 0   ;;  %s2881_s20 = smov 0  }
   0x4   :  { %s2883_s21 = smov 0   ;;  %s2885_s22 = smov 0  }
   0x5   :  { %s2887_s23 = smov 0   ;;  %s2889_s24 = smov 0  }
   0x6 LB: > { %s2164_s25 = sadd.s32 4294967295, %s2840_s24   ;;  %s2165_s26 = sadd.s32 4294967294, %s2840_s24   ;;  %s2840_s24 = sphi %s2889_s24, %s17_s24   ;;  %s2836_s23 = sphi %s2887_s23, %s3376_s23   ;;  %s2832_s22 = sphi %s2885_s22, %s3375_s22   ;;  %s2828_s21 = sphi %s2883_s21, %s3374_s21   ;;  %s2824_s20 = sphi %s2881_s20, %s3373_s20   ;;  %s2820_s19 = sphi %s2879_s19, %s3372_s19   ;;  %s2816_s18 = sphi %s2877_s18, %s3371_s18   ;;  %s2812_s17 = sphi %s2875_s17, %s3370_s17   ;;  %s2808_s16 = sphi %s2873_s16, %s3369_s16   ;;  %s2804_s15 = sphi %s2871_s15, %s3368_s15  }
   0x7   : > { %s29_s27 = sadd.s32 1, %s2828_s21  ;;  %s32_s28 = sadd.s32 1, %s2832_s22 }
   0x8   : > { %p30_p0 = scmp.ge.s32.totalorder %s29_s27, 3  ;;  %s36_s29 = sadd.s32 1, %s2836_s23 }
   0x9   : > { %p148_p1 = scmp.ne.s32.totalorder %s2812_s17, %s2808_s16  ;;  %p149_p2 = scmp.eq.s32.totalorder %s2164_s25, 47 }
   0xa   : > { %s3378_s27 = smov (%p30_p0, %s29_s27), 0  ;;  %s3380_s28 = smov (!%p30_p0, %s32_s28), %s2832_s22 }
   0xb   : > { %p154_p3 = scmp.ne.s32.totalorder %s2808_s16, %s2804_s15  ;;  %p34_p4 = scmp.ge.s32.totalorder %s3380_s28, 8 }
   0xc   : > { %p155_p5 = scmp.eq.s32.totalorder %s2165_s26, 47  ;;  %p2933_p6 = por %p149_p2, %p148_p1 }
   0xd   : > { %s3382_s28 = smov (%p34_p4, %s3380_s28), 0  ;;  %s3384_s29 = smov (!%p34_p4, %s36_s29), %s2836_s23 }
   0xe   : > { %3359 = sst [smem:[#allocation6_spill]] %s3382_s28  ;;  %p2940_p7 = por %p155_p5, %p154_p3 }
   0xf   : > { %p2168_p8 = scmp.ge.s32.totalorder %s2840_s24, 1  ;;  %p38_p9 = scmp.ge.s32.totalorder %s3384_s29, 2 }
  0x10   : > { %p196_p10 = scmp.lt.s32.totalorder %s2840_s24, 49  ;;  %s134_s6 = ssub.s32 %s2832_s22, %s3382_s28 }
  0x11   : > { %s3386_s29 = smov (%p38_p9, %s3384_s29), 0  ;;  %s138_s9 = sadd.s32 1, %s2812_s17 }
  0x12   : > { %3361 = sst [smem:[#allocation7_spill]] %s3386_s29  ;;  %p197_p11 = pnand %p2168_p8, %p196_p10 }
  0x13   : > { %s133_s7 = ssub.s32 %s2836_s23, %s3386_s29  ;;  %s224_s11 = sand.u32 (!%p197_p11), 1, %s2808_s16  }
  0x14   : > { %s135_s8 = sor.u32 %s134_s6, %s133_s7  ;;  %200 = sbr.rel (%p197_p11) target bundleno = 388 (0x184), region = 36 }
  0x15   : > { %p136_p12 = scmp.eq.s32.totalorder %s135_s8, 0  ;;  %s227_s12 = sadd.s32 (!%p197_p11), %s2816_s18, %s2820_s19 }
  0x16   : > { %s2169_s13 = sshll.u32 (!%p197_p11), %s224_s11, 6  ;;  %p228_p13 = scmp.lt.s32.totalorder (!%p197_p11), %s2824_s20, 1 }
  0x17   : > { %s2954_s10 = scalar_select %p136_p12, %s2812_s17, %s138_s9  }
  0x18   : > { %p230_p0 = scmp.lt.s32.totalorder (!%p197_p11), %s227_s12, 9  ;;  %s2968_s28 = scalar_lea.vmem (!%p197_p11), [#allocation3], %s2169_s13 }
  0x19   : > { %p2171_p1 = scmp.ne.s32.totalorder (!%p197_p11), %s2816_s18, 0 }
  0x1b   : > { %s229_s14 = scalar_select %p228_p13, %s2824_s20, 1 }
  0x1c   : > { %s3388_s12 = smov (!%p230_p0, %s227_s12), 9  ;;  %242 = sbr.rel (%p2171_p1) target bundleno = 35 (0x23), region = 40 }
  0x1d   : > { %s2627_s25 = smul.u32 200, %s229_s14  ;;  %v2842_v0 = vmov (!%p2171_p1), 0.0  }
  0x1e   : > { %s2626_s26 = smul.u32 20, %s3388_s12  ;;  %243 = vst [vmem:[#allocation2] sm:$0xff] (!%p2171_p1), %v2842_v0  ;;  %244 = vst [vmem:[#allocation2 + $0x8] sm:$0xff] (!%p2171_p1), %v2842_v0 }
  0x1f   : > { %245 = vst [vmem:[#allocation2 + $0x10] sm:$0xff] (!%p2171_p1), %v2842_v0  ;;  %246 = vst [vmem:[#allocation2 + $0x18] sm:$0xff] (!%p2171_p1), %v2842_v0 }
  0x20   : > { %s234_s6 = sadd.s32 %s2627_s25, %s2626_s26  ;;  %247 = vst [vmem:[#allocation2 + $0x20] sm:$0xff] (!%p2171_p1), %v2842_v0  ;;  %248 = vst [vmem:[#allocation2 + $0x28] sm:$0xff] (!%p2171_p1), %v2842_v0 }
  0x21   : > { %s2170_s7 = sshll.u32 %s234_s6, 2  ;;  %249 = vst [vmem:[#allocation2 + $0x30] sm:$0xff] (!%p2171_p1), %v2842_v0  ;;  %250 = vst [vmem:[#allocation2 + $0x38] sm:$0xff] (!%p2171_p1), %v2842_v0 }
  0x22   : > { %s2966_s29 = scalar_lea.vmem %s3351_s0, %s2170_s7 }
  0x23 PF: > { %s2374_s12 = smul.u32 18, %s2816_s18  ;;  %vm304_vm0 = vcmask 1041408   ;;  %v2718_v1 = vld [vmem:[%s2966_s29] ss:$8 sps:$4 sm:$0xff]   ;;  %vm291_vm1 = vcmask 31744   ;;  %vm672_vm5 = vcmask 1042432  }
  0x24   : > { %v2719_v2 = vld [vmem:[%s2966_s29 + $0x10] ss:$8 sps:$4 sm:$0xff]   ;;  %2422 = vmatprep.mubr.msk.bf16.mxu1 %vm291_vm1, %v2718_v1  ;;  %vm405_vm2 = vsmask.f32 3328  ;;  %vm406_vm3 = vsmask.f32 7440 }
  0x25   : > { %s2976_s25 = scalar_lea.vmem %s3352_s1, %s2374_s12  ;;  %v2227_v9 = vld [vmem:[%s2966_s29 + $0x8] sm:$0xf]  ;;  %v2228_v10 = vld [vmem:[%s2966_s29 + $0xc] sm:$0x1]  ;;  %v2229_v11 = vld [vmem:[%s2966_s29 + $0x10] sm:$0xf] }
  0x26   : > { %v262_v3 = vld [vmem:[%s2976_s25] sm:$0x3]  ;;  %v2182_v4 = vld [vmem:[%s2976_s25 + $0x2] sm:$0x3]  ;;  %v2983_v5 = vld [vmem:[%s2976_s25 + $0x8] sm:$0x3] }
  0x27   : > { %2616 = vmatprep.subr.msk.bf16.mxu1 %vm304_vm0, %v262_v3  ;;  %v306_v6 = vsel %vm304_vm0, %v262_v3, 0  ;;  %v557_v7 = vsel %vm304_vm0, %v2182_v4, 0  ;;  %2620 = vmatprep.subr.msk.bf16.mxu0 %vm304_vm0, %v2983_v5  ;;  %v2992_v8 = vsel %vm304_vm0, %v2983_v5, 0  ;;  %v2230_v12 = vld [vmem:[%s2966_s29 + $0x14] sm:$0x1]  ;;  %v981_v13 = vshrl.u32 %v2227_v9, 16  ;;  %vm3007_vm4 = vmor %vm405_vm2, %vm406_vm3 }
  0x28   : > { %2421 = vmatpush3.bf16.msra.mxu1 %v306_v6  ;;  %2461 = vmatpush3.bf16.msra.mxu0 %v2992_v8  ;;  %v984_v14 = vshll.u32 %v2227_v9, 16  ;;  %v990_v15 = vshll.u32 %v2228_v10, 16  ;;  %v995_v16 = vshrl.u32 %v2229_v11, 16  ;;  %v998_v17 = vshll.u32 %v2229_v11, 16  ;;  %v2231_v19 = vld [vmem:[%s2966_s29 + $0x18] sm:$0xf] }
  0x29   : > { %2617 = vmatprep.subr.msk.bf16.mxu1 %vm304_vm0, %v2182_v4  ;;  %v1004_v18 = vshll.u32 %v2230_v12, 16  ;;  %v983_v20 = vrot.slane %v981_v13, 4  ;;  %v2232_v22 = vld [vmem:[%s2966_s29 + $0x1c] sm:$0x1]  ;;  %v2233_v23 = vld [vmem:[%s2966_s29 + $0x20] sm:$0xf] }
  0x2a   : > { %v986_v21 = vrot.slane %v984_v14, 5  ;;  %v992_v24 = vrot.slane %v990_v15, 5  ;;  %v997_v25 = vrot.slane %v995_v16, 4  ;;  %v1000_v26 = vrot.slane %v998_v17, 5  ;;  %v2234_v28 = vld [vmem:[%s2966_s29 + $0x24] sm:$0x1] }
  0x2b   : > { %2423 = vmatmul.mubr.msk.bf16.vlgmr.msra.gmra.mrb[0].mxu1 %vm291_vm1, %v2719_v2  ;;  %v1006_v27 = vrot.slane %v1004_v18, 5  ;;  %v1009_v30 = vshrl.u32 %v2231_v19, 16  ;;  %v1012_v31 = vshll.u32 %v2231_v19, 16  ;;  %v1018_v32 = vshll.u32 %v2232_v22, 16  ;;  %v2720_v41 = vld [vmem:[%s2966_s29 + $0x20] ss:$8 sps:$4 sm:$0xff]  }
  0x2c   : > { %2431 = vmatpush3.bf16.msra.mxu1 %v557_v7  ;;  %v987_v29 = vor.u32 %v986_v21, %v983_v20  ;;  %v1001_v34 = vor.u32 %v1000_v26, %v997_v25  ;;  %v1023_v35 = vshrl.u32 %v2233_v23, 16  ;;  %v1026_v36 = vshll.u32 %v2233_v23, 16  ;;  %2426 = vmatprep.mubr.msk.bf16.mxu1 %vm291_vm1, %v2720_v41  ;;  %v2721_v48 = vld [vmem:[%s2966_s29 + $0x30] ss:$8 sps:$4 sm:$0xff]   ;;  %v2278_v49 = vld [vmem:[%s2976_s25 + $0xa] sm:$0x3] }
  0x2d   : > { %v1032_v37 = vshll.u32 %v2234_v28, 16  ;;  %v1011_v39 = vrot.slane %v1009_v30, 4  ;;  %v1014_v40 = vrot.slane %v1012_v31, 5  ;;  %v1020_v43 = vrot.slane %v1018_v32, 5  ;;  %2622 = vmatprep.subr.msk.bf16.mxu0 %vm304_vm0, %v2278_v49  ;;  %v389_v54 = vld [vmem:[%s2966_s29] sm:$0xf] }
  0x2e   : > { %v988_v38 = vrot.slane %v987_v29, 4  ;;  %v1002_v42 = vrot.slane %v1001_v34, 4  ;;  %v1025_v44 = vrot.slane %v1023_v35, 4  ;;  %v1028_v45 = vrot.slane %v1026_v36, 5  ;;  %v390_v55 = vld [vmem:[%s2966_s29 + $0x4] sm:$0x1] }
  0x2f   : > { %vm673_vm6 = vcmask 1046532   ;;  %v1015_v47 = vor.u32 %v1014_v40, %v1011_v39  ;;  %v1034_v52 = vrot.slane %v1032_v37, 5  ;;  %v1313_v53 = vsel %vm304_vm0, %v2278_v49, 0  ;;  %v391_v58 = vld [vmem:[%s2966_s29 + $0x8] sm:$0xf]  ;;  %p2365_p2 = scmp.ne.s32.totalorder %s2816_s18, 2 }
  0x30   : > { %v993_v46 = vsel %vm3007_vm4, %v988_v38, %v992_v24  ;;  %v1007_v50 = vsel %vm3007_vm4, %v1002_v42, %v1006_v27  ;;  %v1029_v51 = vor.u32 %v1028_v45, %v1025_v44  ;;  %v392_v59 = vld [vmem:[%s2966_s29 + $0xc] sm:$0x1]  ;;  %v409_v60 = vshrl.u32 %v389_v54, 16  ;;  %v393_v1 = vld [vmem:[%s2966_s29 + $0x10] sm:$0xf]  ;;  %vm3042_vm7 = vmor %vm672_vm5, %vm673_vm6 }
  0x31   : > { %v2245_v56 = vcombine.low %v993_v46, %v1007_v50  ;;  %v1016_v57 = vrot.slane %v1015_v47, 4  ;;  %v412_v62 = vshll.u32 %v389_v54, 16  ;;  %v418_v63 = vshll.u32 %v390_v55, 16  ;;  %v394_v7 = vld [vmem:[%s2966_s29 + $0x14] sm:$0x1] }
  0x32   : > { %v1030_v61 = vrot.slane %v1029_v51, 4  ;;  %v423_v0 = vshrl.u32 %v391_v58, 16  ;;  %v411_v3 = vrot.slane %v409_v60, 4  ;;  %v426_v4 = vshll.u32 %v391_v58, 16  ;;  %v395_v13 = vld [vmem:[%s2966_s29 + $0x18] sm:$0xf] }
  0x33   : > { %2427 = vmatmul.mubr.msk.bf16.gmra.mrb[4].mxu1 %vm291_vm1, %v2721_v48  ;;  %2462 = vmatprep.mubr.msk.bf16.mxu0 %vm291_vm1, %v2245_v56  ;;  %v1021_v2 = vsel %vm3007_vm4, %v1016_v57, %v1020_v43  ;;  %v432_v6 = vshll.u32 %v392_v59, 16  ;;  %v414_v10 = vrot.slane %v412_v62, 5  ;;  %v420_v11 = vrot.slane %v418_v63, 5  ;;  %v396_v17 = vld [vmem:[%s2966_s29 + $0x1c] sm:$0x1] }
  0x34   : > { %v1035_v9 = vsel %vm3007_vm4, %v1030_v61, %v1034_v52  ;;  %v425_v12 = vrot.slane %v423_v0, 4  ;;  %v428_v15 = vrot.slane %v426_v4, 5  ;;  %v437_v18 = vshrl.u32 %v393_v1, 16  ;;  %v2200_v23 = vld [vmem:[%s2976_s25 + $0x4] sm:$0x3] }
  0x35   : > { %v2246_v14 = vcombine.low %v1021_v2, %v1035_v9  ;;  %v434_v16 = vrot.slane %v432_v6, 5  ;;  %v415_v19 = vor.u32 %v414_v10, %v411_v3  ;;  %v440_v20 = vshll.u32 %v393_v1, 16  ;;  %2618 = vmatprep.subr.msk.bf16.mxu1 %vm304_vm0, %v2200_v23  ;;  %v2253_v28 = vld [vmem:[%s2966_s29 + $0x8] sm:$0xe]  ;;  %v2254_v34 = vld [vmem:[%s2966_s29 + $0xc] sm:$0x1] }
  0x36   : > { %v446_v21 = vshll.u32 %v394_v7, 16  ;;  %v451_v22 = vshrl.u32 %v395_v13, 16  ;;  %v429_v24 = vor.u32 %v428_v15, %v425_v12  ;;  %v439_v25 = vrot.slane %v437_v18, 4  ;;  %v2255_v39 = vld [vmem:[%s2966_s29 + $0x10] sm:$0xe] }
  0x37   : > { %2463 = vmatmul.mubr.msk.bf16.vlgmr.msra.gmra.mrb[0].mxu0 %vm291_vm1, %v2246_v14  ;;  %v454_v26 = vshll.u32 %v395_v13, 16  ;;  %v460_v27 = vshll.u32 %v396_v17, 16  ;;  %v416_v29 = vrot.slane %v415_v19, 4  ;;  %v442_v30 = vrot.slane %v440_v20, 5  ;;  %v2256_v43 = vld [vmem:[%s2966_s29 + $0x14] sm:$0x1] }
  0x38   : > { %2471 = vmatpush3.bf16.msra.mxu0 %v1313_v53  ;;  %v448_v31 = vrot.slane %v446_v21, 5  ;;  %v453_v32 = vrot.slane %v451_v22, 4  ;;  %v430_v35 = vrot.slane %v429_v24, 4  ;;  %v2269_v40 = vrot.slane %v2253_v28, 9  ;;  %v2257_v46 = vld [vmem:[%s2966_s29 + $0x18] sm:$0xe] }
  0x39   : > { %v456_v36 = vrot.slane %v454_v26, 5  ;;  %v462_v37 = vrot.slane %v460_v27, 5  ;;  %v421_v41 = vsel %vm3007_vm4, %v416_v29, %v420_v11  ;;  %v443_v42 = vor.u32 %v442_v30, %v439_v25  ;;  %v2258_v51 = vld [vmem:[%s2966_s29 + $0x1c] sm:$0x1]  ;;  %v2259_v52 = vld [vmem:[%s2966_s29 + $0x20] sm:$0xe] }
  0x3a   : > { %v1246_v44 = vrot.slane %v2254_v34, 5  ;;  %v2270_v45 = vrot.slane %v2255_v39, 9  ;;  %v435_v47 = vsel %vm3007_vm4, %v430_v35, %v434_v16  ;;  %v1250_v49 = vrot.slane %v2256_v43, 5  ;;  %v2260_v56 = vld [vmem:[%s2966_s29 + $0x24] sm:$0x1] }
  0x3b   : > { %v457_v48 = vor.u32 %v456_v36, %v453_v32  ;;  %v744_v50 = vsel %vm304_vm0, %v2200_v23, 0  ;;  %v2183_v53 = vcombine.low %v421_v41, %v435_v47  ;;  %v444_v54 = vrot.slane %v443_v42, 4  ;;  %v2296_v58 = vld [vmem:[%s2976_s25 + $0xc] sm:$0x3]  ;;  %v397_v63 = vld [vmem:[%s2966_s29 + $0x20] sm:$0xf] }
  0x3c   : > { %v1247_v55 = vsel %vm3042_vm7, %v2269_v40, %v1246_v44  ;;  %v2271_v57 = vrot.slane %v2257_v46, 9  ;;  %v1251_v60 = vsel %vm3042_vm7, %v2270_v45, %v1250_v49  ;;  %v1254_v61 = vrot.slane %v2258_v51, 5  ;;  %2623 = vmatprep.subr.msk.bf16.mxu0 %vm304_vm0, %v2296_v58  ;;  %v398_v3 = vld [vmem:[%s2966_s29 + $0x24] sm:$0x1]  ;;  %v399_v4 = vld [vmem:[%s2966_s29 + $0x28] sm:$0xf] }
  0x3d   : > { %v458_v59 = vrot.slane %v457_v48, 4  ;;  %v2272_v62 = vrot.slane %v2259_v52, 9  ;;  %2432 = vmatprep.mubr.msk.bf16.mxu1 %vm291_vm1, %v2183_v53  ;;  %v449_v0 = vsel %vm3007_vm4, %v444_v54, %v448_v31  ;;  %v2279_v1 = vcombine.low %v1247_v55, %v1251_v60  ;;  %v400_v10 = vld [vmem:[%s2966_s29 + $0x2c] sm:$0x1]  ;;  %v401_v13 = vld [vmem:[%s2966_s29 + $0x30] sm:$0xf] }
  0x3e   : > { %v1258_v2 = vrot.slane %v2260_v56, 5  ;;  %v465_v6 = vshrl.u32 %v397_v63, 16  ;;  %v1255_v9 = vsel %vm3042_vm7, %v2271_v57, %v1254_v61  ;;  %v468_v11 = vshll.u32 %v397_v63, 16  ;;  %v402_v18 = vld [vmem:[%s2966_s29 + $0x34] sm:$0x1] }
  0x3f   : > { %v463_v7 = vsel %vm3007_vm4, %v458_v59, %v462_v37  ;;  %v474_v12 = vshll.u32 %v398_v3, 16  ;;  %2472 = vmatprep.mubr.msk.bf16.mxu0 %vm291_vm1, %v2279_v1  ;;  %v479_v17 = vshrl.u32 %v399_v4, 16  ;;  %v403_v19 = vld [vmem:[%s2966_s29 + $0x38] sm:$0xf]  ;;  %v482_v23 = vshll.u32 %v399_v4, 16 }
  0x40   : > { %v2184_v14 = vcombine.low %v449_v0, %v463_v7  ;;  %v1259_v15 = vsel %vm3042_vm7, %v2272_v62, %v1258_v2  ;;  %v467_v16 = vrot.slane %v465_v6, 4  ;;  %v470_v21 = vrot.slane %v468_v11, 5  ;;  %v404_v24 = vld [vmem:[%s2966_s29 + $0x3c] sm:$0x1]  ;;  %v2261_v29 = vld [vmem:[%s2966_s29 + $0x28] sm:$0xe] }
  0x41   : > { %v2280_v20 = vcombine.low %v1255_v9, %v1259_v15  ;;  %v476_v22 = vrot.slane %v474_v12, 5  ;;  %v481_v25 = vrot.slane %v479_v17, 4  ;;  %v488_v26 = vshll.u32 %v400_v10, 16  ;;  %v2262_v35 = vld [vmem:[%s2966_s29 + $0x2c] sm:$0x1] }
  0x42   : > { %2433 = vmatmul.mubr.msk.bf16.vlgmr.msra.gmra.mrb[0].mxu1 %vm291_vm1, %v2184_v14  ;;  %v1450_v27 = vsel %vm304_vm0, %v2296_v58, 0  ;;  %v493_v28 = vshrl.u32 %v401_v13, 16  ;;  %v471_v30 = vor.u32 %v470_v21, %v467_v16  ;;  %v484_v31 = vrot.slane %v482_v23, 5  ;;  %v2263_v41 = vld [vmem:[%s2966_s29 + $0x30] sm:$0xe] }
  0x43   : > { %2441 = vmatpush3.bf16.msra.mxu1 %v744_v50  ;;  %2473 = vmatmul.mubr.msk.bf16.vlgmr.msra.gmra.mrb[0].mxu0 %vm291_vm1, %v2280_v20  ;;  %v496_v32 = vshll.u32 %v401_v13, 16  ;;  %v502_v34 = vshll.u32 %v402_v18, 16  ;;  %v490_v36 = vrot.slane %v488_v26, 5  ;;  %v507_v39 = vshrl.u32 %v403_v19, 16  ;;  %v2264_v46 = vld [vmem:[%s2966_s29 + $0x34] sm:$0x1] }
  0x44   : > { %2481 = vmatpush3.bf16.msra.mxu0 %v1450_v27  ;;  %v495_v37 = vrot.slane %v493_v28, 4  ;;  %v510_v40 = vshll.u32 %v403_v19, 16  ;;  %v472_v42 = vrot.slane %v471_v30, 4  ;;  %v485_v43 = vor.u32 %v484_v31, %v481_v25  ;;  %v2265_v51 = vld [vmem:[%s2966_s29 + $0x38] sm:$0xe] }
  0x45   : > { %v498_v44 = vrot.slane %v496_v32, 5  ;;  %v504_v45 = vrot.slane %v502_v34, 5  ;;  %v509_v47 = vrot.slane %v507_v39, 4  ;;  %v516_v49 = vshll.u32 %v404_v24, 16  ;;  %v2266_v56 = vld [vmem:[%s2966_s29 + $0x3c] sm:$0x1] }
  0x46   : > { %v512_v48 = vrot.slane %v510_v40, 5  ;;  %v2273_v50 = vrot.slane %v2261_v29, 9  ;;  %v477_v52 = vsel %vm3007_vm4, %v472_v42, %v476_v22  ;;  %v486_v53 = vrot.slane %v485_v43, 4  ;;  %v2267_v57 = vld [vmem:[%s2966_s29 + $0x40] sm:$0xe] }
  0x47   : > { %v499_v54 = vor.u32 %v498_v44, %v495_v37  ;;  %v1262_v55 = vrot.slane %v2262_v35, 5  ;;  %v518_v59 = vrot.slane %v516_v49, 5  ;;  %v2274_v60 = vrot.slane %v2263_v41, 9  ;;  %v2268_v62 = vld [vmem:[%s2966_s29 + $0x44] sm:$0x1] }
  0x48   : > { %v513_v58 = vor.u32 %v512_v48, %v509_v47  ;;  %v1266_v61 = vrot.slane %v2264_v46, 5  ;;  %v491_v63 = vsel %vm3007_vm4, %v486_v53, %v490_v36  ;;  %v2275_v2 = vrot.slane %v2265_v51, 9  ;;  %v640_v3 = vld [vmem:[%s2966_s29] sm:$0xe]  ;;  %v641_v4 = vld [vmem:[%s2966_s29 + $0x4] sm:$0x1] }
  0x49   : > { %v500_v0 = vrot.slane %v499_v54, 4  ;;  %v1263_v1 = vsel %vm3042_vm7, %v2273_v50, %v1262_v55  ;;  %v2185_v6 = vcombine.low %v477_v52, %v491_v63  ;;  %v1270_v10 = vrot.slane %v2266_v56, 5  ;;  %v642_v11 = vld [vmem:[%s2966_s29 + $0x8] sm:$0xe]  ;;  %v643_v12 = vld [vmem:[%s2966_s29 + $0xc] sm:$0x1] }
  0x4a   : > { %v514_v7 = vrot.slane %v513_v58, 4  ;;  %v1267_v9 = vsel %vm3042_vm7, %v2274_v60, %v1266_v61  ;;  %v2276_v15 = vrot.slane %v2267_v57, 9  ;;  %v1274_v16 = vrot.slane %v2268_v62, 5  ;;  %v644_v17 = vld [vmem:[%s2966_s29 + $0x10] sm:$0xe] }
  0x4b   : > { %v505_v13 = vsel %vm3007_vm4, %v500_v0, %v504_v45  ;;  %v2281_v14 = vcombine.low %v1263_v1, %v1267_v9  ;;  %v645_v18 = vld [vmem:[%s2966_s29 + $0x14] sm:$0x1]  ;;  %2436 = vmatprep.mubr.msk.bf16.mxu1 %vm291_vm1, %v2185_v6  ;;  %v1271_v20 = vsel %vm3042_vm7, %v2275_v2, %v1270_v10  ;;  %v2191_v21 = vrot.slane %v640_v3, 9  ;;  %v646_v23 = vld [vmem:[%s2966_s29 + $0x18] sm:$0xe] }
  0x4c   : > { %v519_v19 = vsel %vm3007_vm4, %v514_v7, %v518_v59  ;;  %v677_v22 = vrot.slane %v641_v4, 5  ;;  %v647_v24 = vld [vmem:[%s2966_s29 + $0x1c] sm:$0x1]  ;;  %v1275_v26 = vsel %vm3042_vm7, %v2276_v15, %v1274_v16  ;;  %v2192_v27 = vrot.slane %v642_v11, 9  ;;  %v2218_v29 = vld [vmem:[%s2976_s25 + $0x6] sm:$0x3] }
  0x4d   : > { %v2186_v25 = vcombine.low %v505_v13, %v519_v19  ;;  %2476 = vmatprep.mubr.msk.bf16.mxu0 %vm291_vm1, %v2281_v14  ;;  %v681_v28 = vrot.slane %v643_v12, 5  ;;  %v2282_v30 = vcombine.low %v1271_v20, %v1275_v26  ;;  %v2193_v32 = vrot.slane %v644_v17, 9  ;;  %2619 = vmatprep.subr.msk.bf16.mxu1 %vm304_vm0, %v2218_v29  ;;  %v2722_v35 = vld [vmem:[%s2966_s29 + $0x10] ss:$8 sps:$4 sm:$0xff]   ;;  %v2322_v42 = vld [vmem:[%s2976_s25 + $0xe] sm:$0x3] }
  0x4e   : > { %v678_v31 = vsel %vm3042_vm7, %v2191_v21, %v677_v22  ;;  %v685_v34 = vrot.slane %v645_v18, 5  ;;  %v2194_v37 = vrot.slane %v646_v23, 9  ;;  %v689_v39 = vrot.slane %v647_v24, 5  ;;  %2624 = vmatprep.subr.msk.bf16.mxu0 %vm304_vm0, %v2322_v42  ;;  %v648_v44 = vld [vmem:[%s2966_s29 + $0x20] sm:$0xe] }
  0x4f   : > { %2437 = vmatmul.mubr.msk.bf16.gmra.mrb[4].mxu1 %vm291_vm1, %v2186_v25  ;;  %v682_v36 = vsel %vm3042_vm7, %v2192_v27, %v681_v28  ;;  %2477 = vmatmul.mubr.msk.bf16.gmra.mrb[4].mxu0 %vm291_vm1, %v2282_v30  ;;  %v649_v45 = vld [vmem:[%s2966_s29 + $0x24] sm:$0x1]  ;;  %v650_v46 = vld [vmem:[%s2966_s29 + $0x28] sm:$0xe]  ;;  %v881_v47 = vsel %vm304_vm0, %v2218_v29, 0  ;;  %v2195_v50 = vrot.slane %v648_v44, 9 }
  0x50   : > { %v2201_v40 = vcombine.low %v678_v31, %v682_v36  ;;  %v686_v41 = vsel %vm3042_vm7, %v2193_v32, %v685_v34  ;;  %v690_v43 = vsel %vm3042_vm7, %v2194_v37, %v689_v39  ;;  %2482 = vmatprep.mubr.msk.bf16.mxu0 %vm291_vm1, %v2722_v35  ;;  %v2723_v48 = vld [vmem:[%s2966_s29 + $0x20] ss:$8 sps:$4 sm:$0xff]   ;;  %v651_v49 = vld [vmem:[%s2966_s29 + $0x2c] sm:$0x1]  ;;  %v693_v51 = vrot.slane %v649_v45, 5 }
  0x51   : > { %v2196_v52 = vrot.slane %v650_v46, 9  ;;  %v2202_v53 = vcombine.low %v686_v41, %v690_v43  ;;  %v697_v54 = vrot.slane %v651_v49, 5  ;;  %v1698_v55 = vsel %vm304_vm0, %v2322_v42, 0  ;;  %v652_v56 = vld [vmem:[%s2966_s29 + $0x30] sm:$0xe] }
  0x52   : > { %2442 = vmatprep.mubr.msk.bf16.mxu1 %vm291_vm1, %v2201_v40  ;;  %v653_v57 = vld [vmem:[%s2966_s29 + $0x34] sm:$0x1]  ;;  %v694_v58 = vsel %vm3042_vm7, %v2195_v50, %v693_v51  ;;  %v654_v59 = vld [vmem:[%s2966_s29 + $0x38] sm:$0xe]  ;;  %v655_v60 = vld [vmem:[%s2966_s29 + $0x3c] sm:$0x1] }
  0x53   : > { %v2197_v61 = vrot.slane %v652_v56, 9  ;;  %v701_v62 = vrot.slane %v653_v57, 5  ;;  %v698_v63 = vsel %vm3042_vm7, %v2196_v52, %v697_v54  ;;  %v2198_v0 = vrot.slane %v654_v59, 9  ;;  %v2724_v3 = vld [vmem:[%s2966_s29 + $0x30] ss:$8 sps:$4 sm:$0xff]  }
  0x54   : > { %v705_v1 = vrot.slane %v655_v60, 5  ;;  %v2203_v2 = vcombine.low %v694_v58, %v698_v63  ;;  %v2305_v7 = vld [vmem:[%s2966_s29 + $0x10] sm:$0xf]  ;;  %v2306_v9 = vld [vmem:[%s2966_s29 + $0x14] sm:$0x1] }
  0x55   : > { %v702_v4 = vsel %vm3042_vm7, %v2197_v61, %v701_v62  ;;  %v2725_v11 = vld [vmem:[%s2966_s29 + $0x40] ss:$8 sps:$4 sm:$0xff]   ;;  %v2307_v13 = vld [vmem:[%s2966_s29 + $0x18] sm:$0xf]  ;;  %v2308_v14 = vld [vmem:[%s2966_s29 + $0x1c] sm:$0x1] }
  0x56   : > { %v706_v6 = vsel %vm3042_vm7, %v2198_v0, %v705_v1  ;;  %v2726_v12 = vld [vmem:[%s2966_s29 + $0x8] ss:$8 sps:$4 sm:$0xff]   ;;  %v1550_v15 = vshrl.u32 %v2305_v7, 16  ;;  %v1553_v16 = vshll.u32 %v2305_v7, 16  ;;  %v1559_v17 = vshll.u32 %v2306_v9, 16 }
  0x57   : > { %2443 = vmatmul.mubr.msk.bf16.vlgmr.msra.gmra.mrb[0].mxu1 %vm291_vm1, %v2202_v53  ;;  %2483 = vmatmul.mubr.msk.bf16.vlgmr.msra.gmra.mrb[0].mxu0 %vm291_vm1, %v2723_v48  ;;  %v2204_v10 = vcombine.low %v702_v4, %v706_v6  ;;  %v1564_v18 = vshrl.u32 %v2307_v13, 16  ;;  %v1567_v19 = vshll.u32 %v2307_v13, 16  ;;  %v1573_v20 = vshll.u32 %v2308_v14, 16  ;;  %v2309_v21 = vld [vmem:[%s2966_s29 + $0x20] sm:$0xf] }
  0x58   : > { %2451 = vmatpush3.bf16.msra.mxu1 %v881_v47  ;;  %2446 = vmatprep.mubr.msk.bf16.mxu1 %vm291_vm1, %v2203_v2  ;;  %v1552_v22 = vrot.slane %v1550_v15, 4  ;;  %v1555_v23 = vrot.slane %v1553_v16, 5  ;;  %v2310_v24 = vld [vmem:[%s2966_s29 + $0x24] sm:$0x1]  ;;  %v2311_v25 = vld [vmem:[%s2966_s29 + $0x28] sm:$0xf] }
  0x59   : > { %2491 = vmatpush3.bf16.msra.mxu0 %v1698_v55  ;;  %2486 = vmatprep.mubr.msk.bf16.mxu0 %vm291_vm1, %v2724_v3  ;;  %v1561_v26 = vrot.slane %v1559_v17, 5  ;;  %v1566_v27 = vrot.slane %v1564_v18, 4  ;;  %v1569_v28 = vrot.slane %v1567_v19, 5  ;;  %v1575_v29 = vrot.slane %v1573_v20, 5  ;;  %v2356_v35 = vld [vmem:[%s2976_s25 + $0x10] sm:$0x3] }
  0x5a   : > { %2621 = vmatprep.subr.msk.bf16.mxu1 %vm304_vm0, %v2983_v5  ;;  %v2312_v5 = vld [vmem:[%s2966_s29 + $0x2c] sm:$0x1]  ;;  %v1556_v30 = vor.u32 %v1555_v23, %v1552_v22  ;;  %v1578_v31 = vshrl.u32 %v2309_v21, 16  ;;  %v1581_v32 = vshll.u32 %v2309_v21, 16  ;;  %v1587_v34 = vshll.u32 %v2310_v24, 16  ;;  %2625 = vmatprep.subr.msk.bf16.mxu0 %vm304_vm0, %v2356_v35 }
  0x5b   : > { %v1570_v36 = vor.u32 %v1569_v28, %v1566_v27  ;;  %v1592_v37 = vshrl.u32 %v2311_v25, 16  ;;  %v1595_v39 = vshll.u32 %v2311_v25, 16  ;;  %v1601_v40 = vshll.u32 %v2312_v5, 16  ;;  %v2727_v44 = vld [vmem:[%s2966_s29 + $0x18] ss:$8 sps:$4 sm:$0xff]  }
  0x5c   : > { %v1557_v41 = vrot.slane %v1556_v30, 4  ;;  %v1580_v42 = vrot.slane %v1578_v31, 4  ;;  %v1583_v43 = vrot.slane %v1581_v32, 5  ;;  %v1589_v46 = vrot.slane %v1587_v34, 5  ;;  %v2728_v51 = vld [vmem:[%s2966_s29 + $0x28] ss:$8 sps:$4 sm:$0xff]  }
  0x5d   : > { %v1571_v45 = vrot.slane %v1570_v36, 4  ;;  %v1594_v47 = vrot.slane %v1592_v37, 4  ;;  %v1597_v48 = vrot.slane %v1595_v39, 5  ;;  %v1603_v54 = vrot.slane %v1601_v40, 5  ;;  %v2313_v56 = vld [vmem:[%s2966_s29 + $0x30] sm:$0xf] }
  0x5e   : > { %v1562_v49 = vsel %vm3007_vm4, %v1557_v41, %v1561_v26  ;;  %v1584_v50 = vor.u32 %v1583_v43, %v1580_v42  ;;  %v1882_v55 = vsel %vm304_vm0, %v2356_v35, 0  ;;  %v2314_v57 = vld [vmem:[%s2966_s29 + $0x34] sm:$0x1]  ;;  %v2315_v60 = vld [vmem:[%s2966_s29 + $0x38] sm:$0xf]  ;;  %v1606_v62 = vshrl.u32 %v2313_v56, 16 }
  0x5f   : > { %2447 = vmatmul.mubr.msk.bf16.gmra.mrb[4].mxu1 %vm291_vm1, %v2204_v10  ;;  %2487 = vmatmul.mubr.msk.bf16.gmra.mrb[4].mxu0 %vm291_vm1, %v2725_v11  ;;  %v1576_v52 = vsel %vm3007_vm4, %v1571_v45, %v1575_v29  ;;  %v1598_v53 = vor.u32 %v1597_v48, %v1594_v47  ;;  %v2316_v61 = vld [vmem:[%s2966_s29 + $0x3c] sm:$0x1]  ;;  %v1609_v0 = vshll.u32 %v2313_v56, 16  ;;  %v1615_v1 = vshll.u32 %v2314_v57, 16  ;;  %v2317_v3 = vld [vmem:[%s2966_s29 + $0x40] sm:$0xf] }
  0x60   : > { %2452 = vmatprep.mubr.msk.bf16.mxu1 %vm291_vm1, %v2726_v12  ;;  %v2323_v58 = vcombine.low %v1562_v49, %v1576_v52  ;;  %v1585_v59 = vrot.slane %v1584_v50, 4  ;;  %v1620_v2 = vshrl.u32 %v2315_v60, 16  ;;  %v1608_v6 = vrot.slane %v1606_v62, 4  ;;  %v2318_v10 = vld [vmem:[%s2966_s29 + $0x44] sm:$0x1] }
  0x61   : > { %v1599_v63 = vrot.slane %v1598_v53, 4  ;;  %v1623_v7 = vshll.u32 %v2315_v60, 16  ;;  %v1629_v9 = vshll.u32 %v2316_v61, 16  ;;  %v1611_v12 = vrot.slane %v1609_v0, 5  ;;  %v2319_v15 = vld [vmem:[%s2966_s29 + $0x48] sm:$0xf] }
  0x62   : > { %2492 = vmatprep.mubr.msk.bf16.mxu0 %vm291_vm1, %v2323_v58  ;;  %v1590_v4 = vsel %vm3007_vm4, %v1585_v59, %v1589_v46  ;;  %v1617_v13 = vrot.slane %v1615_v1, 5  ;;  %v1622_v14 = vrot.slane %v1620_v2, 4  ;;  %v2320_v19 = vld [vmem:[%s2966_s29 + $0x4c] sm:$0x1]  ;;  %v1634_v20 = vshrl.u32 %v2317_v3, 16 }
  0x63   : > { %v1604_v11 = vsel %vm3007_vm4, %v1599_v63, %v1603_v54  ;;  %v1625_v17 = vrot.slane %v1623_v7, 5  ;;  %v1631_v18 = vrot.slane %v1629_v9, 5  ;;  %v2729_v21 = vld [vmem:[%s2966_s29 + $0x38] ss:$8 sps:$4 sm:$0xff]   ;;  %v1612_v22 = vor.u32 %v1611_v12, %v1608_v6  ;;  %v2331_v26 = vld [vmem:[%s2966_s29 + $0x10] sm:$0xe] }
  0x64   : > { %v2324_v16 = vcombine.low %v1590_v4, %v1604_v11  ;;  %v1637_v23 = vshll.u32 %v2317_v3, 16  ;;  %v1643_v24 = vshll.u32 %v2318_v10, 16  ;;  %v1648_v25 = vshrl.u32 %v2319_v15, 16  ;;  %v2332_v5 = vld [vmem:[%s2966_s29 + $0x14] sm:$0x1] }
  0x65   : > { %v1626_v27 = vor.u32 %v1625_v17, %v1622_v14  ;;  %v1651_v28 = vshll.u32 %v2319_v15, 16  ;;  %v1657_v29 = vshll.u32 %v2320_v19, 16  ;;  %v1613_v30 = vrot.slane %v1612_v22, 4  ;;  %v2333_v35 = vld [vmem:[%s2966_s29 + $0x18] sm:$0xe] }
  0x66   : > { %v1639_v31 = vrot.slane %v1637_v23, 5  ;;  %v1645_v32 = vrot.slane %v1643_v24, 5  ;;  %v1650_v34 = vrot.slane %v1648_v25, 4  ;;  %v2334_v40 = vld [vmem:[%s2966_s29 + $0x1c] sm:$0x1]  ;;  %v2347_v41 = vrot.slane %v2331_v26, 9 }
  0x67   : > { %2453 = vmatmul.mubr.msk.bf16.vlgmr.msra.gmra.mrb[0].mxu1 %vm291_vm1, %v2727_v44  ;;  %2493 = vmatmul.mubr.msk.bf16.vlgmr.msra.gmra.mrb[0].mxu0 %vm291_vm1, %v2324_v16  ;;  %v1627_v36 = vrot.slane %v1626_v27, 4  ;;  %v1653_v37 = vrot.slane %v1651_v28, 5  ;;  %v1659_v39 = vrot.slane %v1657_v29, 5  ;;  %v1618_v42 = vsel %vm3007_vm4, %v1613_v30, %v1617_v13  ;;  %v2335_v46 = vld [vmem:[%s2966_s29 + $0x20] sm:$0xe] }
  0x68   : > { %2511 = vmatpush3.bf16.msra.mxu1 %v2992_v8  ;;  %2456 = vmatprep.mubr.msk.bf16.mxu1 %vm291_vm1, %v2728_v51  ;;  %v1636_v8 = vrot.slane %v1634_v20, 4  ;;  %v1815_v44 = vrot.slane %v2332_v5, 5  ;;  %v2348_v45 = vrot.slane %v2333_v35, 9  ;;  %v2336_v47 = vld [vmem:[%s2966_s29 + $0x24] sm:$0x1]  ;;  %v1819_v50 = vrot.slane %v2334_v40, 5 }
  0x69   : > { %2501 = vmatpush3.bf16.msra.mxu0 %v1882_v55  ;;  %v1632_v48 = vsel %vm3007_vm4, %v1627_v36, %v1631_v18  ;;  %v1654_v49 = vor.u32 %v1653_v37, %v1650_v34  ;;  %v2337_v51 = vld [vmem:[%s2966_s29 + $0x28] sm:$0xe]  ;;  %v2338_v52 = vld [vmem:[%s2966_s29 + $0x2c] sm:$0x1]  ;;  %v2349_v53 = vrot.slane %v2335_v46, 9  ;;  %v1823_v57 = vrot.slane %v2336_v47, 5 }
  0x6a   : > { %v1640_v43 = vor.u32 %v1639_v31, %v1636_v8  ;;  %v2325_v54 = vcombine.low %v1618_v42, %v1632_v48  ;;  %v1816_v56 = vsel %vm3042_vm7, %v2347_v41, %v1815_v44  ;;  %v2235_v58 = vld [vmem:[%s2966_s29 + $0x28] sm:$0xf]  ;;  %v2236_v59 = vld [vmem:[%s2966_s29 + $0x2c] sm:$0x1]  ;;  %v1820_v61 = vsel %vm3042_vm7, %v2348_v45, %v1819_v50  ;;  %v2237_v0 = vld [vmem:[%s2966_s29 + $0x30] sm:$0xf] }
  0x6b   : > { %v1655_v60 = vrot.slane %v1654_v49, 4  ;;  %v2350_v62 = vrot.slane %v2337_v51, 9  ;;  %v1827_v63 = vrot.slane %v2338_v52, 5  ;;  %v2357_v2 = vcombine.low %v1816_v56, %v1820_v61  ;;  %v2238_v4 = vld [vmem:[%s2966_s29 + $0x34] sm:$0x1] }
  0x6c   : > { %v1641_v55 = vrot.slane %v1640_v43, 4  ;;  %2496 = vmatprep.mubr.msk.bf16.mxu0 %vm291_vm1, %v2325_v54  ;;  %v1824_v3 = vsel %vm3042_vm7, %v2349_v53, %v1823_v57  ;;  %v1037_v6 = vshrl.u32 %v2235_v58, 16  ;;  %v1040_v10 = vshll.u32 %v2235_v58, 16  ;;  %v2239_v12 = vld [vmem:[%s2966_s29 + $0x38] sm:$0xf] }
  0x6d   : > { %v1660_v7 = vsel %vm3007_vm4, %v1655_v60, %v1659_v39  ;;  %v1828_v9 = vsel %vm3042_vm7, %v2350_v62, %v1827_v63  ;;  %v1046_v11 = vshll.u32 %v2236_v59, 16  ;;  %v2240_v13 = vld [vmem:[%s2966_s29 + $0x3c] sm:$0x1]  ;;  %v1051_v17 = vshrl.u32 %v2237_v0, 16  ;;  %v2241_v18 = vld [vmem:[%s2966_s29 + $0x40] sm:$0xf] }
  0x6e   : > { %v1646_v1 = vsel %vm3007_vm4, %v1641_v55, %v1645_v32  ;;  %v2358_v15 = vcombine.low %v1824_v3, %v1828_v9  ;;  %v1039_v16 = vrot.slane %v1037_v6, 4  ;;  %v2242_v19 = vld [vmem:[%s2966_s29 + $0x44] sm:$0x1]  ;;  %v1042_v20 = vrot.slane %v1040_v10, 5  ;;  %v2339_v24 = vld [vmem:[%s2966_s29 + $0x30] sm:$0xe] }
  0x6f   : > { %2457 = vmatmul.mubr.msk.bf16.gmra.mrb[4].mxu1 %vm291_vm1, %v2729_v21  ;;  %v2326_v14 = vcombine.low %v1646_v1, %v1660_v7  ;;  %v1048_v21 = vrot.slane %v1046_v11, 5  ;;  %v1054_v22 = vshll.u32 %v2237_v0, 16  ;;  %v1060_v23 = vshll.u32 %v2238_v4, 16  ;;  %v2340_v25 = vld [vmem:[%s2966_s29 + $0x34] sm:$0x1] }
  0x70   : > { %v1053_v26 = vrot.slane %v1051_v17, 4  ;;  %v1065_v27 = vshrl.u32 %v2239_v12, 16  ;;  %v1068_v8 = vshll.u32 %v2239_v12, 16  ;;  %v1074_v28 = vshll.u32 %v2240_v13, 16  ;;  %v2341_v29 = vld [vmem:[%s2966_s29 + $0x38] sm:$0xe] }
  0x71   : > { %2497 = vmatmul.mubr.msk.bf16.gmra.mrb[4].mxu0 %vm291_vm1, %v2326_v14  ;;  %v1043_v5 = vor.u32 %v1042_v20, %v1039_v16  ;;  %v1056_v30 = vrot.slane %v1054_v22, 5  ;;  %v1062_v31 = vrot.slane %v1060_v23, 5  ;;  %v1079_v32 = vshrl.u32 %v2241_v18, 16  ;;  %v2342_v34 = vld [vmem:[%s2966_s29 + $0x3c] sm:$0x1]  ;;  %v265_v17 = vld [vmem:[#allocation2 + $0x10] sm:$0xff] }
  0x72   : > { %2502 = vmatprep.mubr.msk.bf16.mxu0 %vm291_vm1, %v2357_v2  ;;  %v1067_v35 = vrot.slane %v1065_v27, 4  ;;  %v1070_v36 = vrot.slane %v1068_v8, 5  ;;  %v1076_v37 = vrot.slane %v1074_v28, 5  ;;  %v1082_v39 = vshll.u32 %v2241_v18, 16  ;;  %v2343_v40 = vld [vmem:[%s2966_s29 + $0x40] sm:$0xe] }
  0x73   : > { %v1044_v41 = vrot.slane %v1043_v5, 4  ;;  %v1057_v42 = vor.u32 %v1056_v30, %v1053_v26  ;;  %v1081_v43 = vrot.slane %v1079_v32, 4  ;;  %v1088_v44 = vshll.u32 %v2242_v19, 16  ;;  %v2344_v45 = vld [vmem:[%s2966_s29 + $0x44] sm:$0x1]  ;;  %v266_v19 = vld [vmem:[#allocation2 + $0x18] sm:$0xff] }
  0x74   : > { %v1071_v46 = vor.u32 %v1070_v36, %v1067_v35  ;;  %v1084_v47 = vrot.slane %v1082_v39, 5  ;;  %v2351_v48 = vrot.slane %v2339_v24, 9  ;;  %v1831_v49 = vrot.slane %v2340_v25, 5  ;;  %v2345_v50 = vld [vmem:[%s2966_s29 + $0x48] sm:$0xe]  ;;  %v263_v18 = vld [vmem:[#allocation2] sm:$0xff] }
  0x75   : > { %v1049_v51 = vsel %vm3007_vm4, %v1044_v41, %v1048_v21  ;;  %v1058_v52 = vrot.slane %v1057_v42, 4  ;;  %v1090_v53 = vrot.slane %v1088_v44, 5  ;;  %v2352_v54 = vrot.slane %v2341_v29, 9  ;;  %v2346_v59 = vld [vmem:[%s2966_s29 + $0x4c] sm:$0x1]  ;;  %v269_v29 = vld [vmem:[#allocation2 + $0x30] sm:$0xff] }
  0x76   : > { %v1072_v55 = vrot.slane %v1071_v46, 4  ;;  %v1085_v56 = vor.u32 %v1084_v47, %v1081_v43  ;;  %v1832_v57 = vsel %vm3042_vm7, %v2351_v48, %v1831_v49  ;;  %v1835_v58 = vrot.slane %v2342_v34, 5  ;;  %v264_v20 = vld [vmem:[#allocation2 + $0x8] sm:$0xff]  ;;  %v270_v34 = vld [vmem:[#allocation2 + $0x38] sm:$0xff] }
  0x77   : > { %v1063_v60 = vsel %vm3007_vm4, %v1058_v52, %v1062_v31  ;;  %v2353_v61 = vrot.slane %v2343_v40, 9  ;;  %v1839_v62 = vrot.slane %v2344_v45, 5  ;;  %v2354_v63 = vrot.slane %v2345_v50, 9  ;;  %v267_v31 = vld [vmem:[#allocation2 + $0x20] sm:$0xff] }
  0x78   : > { %v2247_v0 = vcombine.low %v1049_v51, %v1063_v60  ;;  %v1077_v1 = vsel %vm3007_vm4, %v1072_v55, %v1076_v37  ;;  %v1086_v2 = vrot.slane %v1085_v56, 4  ;;  %v1836_v3 = vsel %vm3042_vm7, %v2352_v54, %v1835_v58  ;;  %v268_v37 = vld [vmem:[#allocation2 + $0x28] sm:$0xff]  ;;  %v2366_v52 = vld [vmem:[%s3353_s2] ss:$0 sm:$0xff] (!%p2365_p2) }
  0x79   : > { %2503 = vmatmul.mubr.msk.bf16.vlgmr.msra.gmra.mrb[0].mxu0 %vm291_vm1, %v2358_v15  ;;  %v2359_v4 = vcombine.low %v1832_v57, %v1836_v3  ;;  %v1840_v6 = vsel %vm3042_vm7, %v2353_v61, %v1839_v62  ;;  %v1843_v7 = vrot.slane %v2346_v59, 5 }
  0x7a   : > { %2466 = vmatprep.mubr.msk.bf16.mxu1 %vm291_vm1, %v2247_v0  ;;  %v1091_v9 = vsel %vm3007_vm4, %v1086_v2, %v1090_v53  ;;  %v2367_v53 = vld [vmem:[%s3354_s3] ss:$0 sm:$0xff] (!%p2365_p2) }
  0x7b   : > { %v2248_v10 = vcombine.low %v1077_v1, %v1091_v9  ;;  %2506 = vmatprep.mubr.msk.bf16.mxu0 %vm291_vm1, %v2359_v4  ;;  %v1844_v11 = vsel %vm3042_vm7, %v2354_v63, %v1843_v7 }
  0x7c   : > { %v2360_v12 = vcombine.low %v1840_v6, %v1844_v11 }
  0x7d   : > { %2467 = vmatmul.mubr.msk.bf16.vlgmr.msra.gmra.mrb[4].mxu1 %vm291_vm1, %v2248_v10 }
  0x81   : > { %2507 = vmatmul.mubr.msk.bf16.gmra.mrb[4].mxu0 %vm291_vm1, %v2360_v12 }
 0x13a   : > { %v2454_v13 = vpop.f32.mrb[0].mxu1 }
 0x13b   : > { %v917_v14 = vpop.f32.mrb[1].mxu1  ;;  %v2514_v33 = vadd.f32 %v2454_v13, %v265_v17 }
 0x13c   : > { %v2455_v15 = vpop.f32.mrb[2].mxu1  ;;  %v2520_v21 = vadd.f32 %v917_v14, %v263_v18 }
 0x13d   : > { %v920_v16 = vpop.f32.mrb[3].mxu1  ;;  %v2526_v23 = vadd.f32 %v2455_v15, %v266_v19 }
 0x13e   : > { %v2532_v25 = vadd.f32 %v920_v16, %v264_v20 }
 0x14c   : > { %v2504_v22 = vpop.f32.mrb[0].mxu0 }
 0x14d   : > { %v2517_v24 = vadd.f32 %v2514_v33, %v2504_v22  ;;  %v1918_v38 = vpop.f32.mrb[1].mxu0 }
 0x14e   : > { %v2523_v26 = vadd.f32 %v2520_v21, %v1918_v38  ;;  %v2505_v27 = vpop.f32.mrb[2].mxu0 }
 0x14f   : > { %1959 = vst [vmem:[#allocation2 + $0x10] sm:$0xff] %v2517_v24  ;;  %v2529_v8 = vadd.f32 %v2526_v23, %v2505_v27  ;;  %v1921_v28 = vpop.f32.mrb[3].mxu0 }
 0x150   : > { %1957 = vst [vmem:[#allocation2] sm:$0xff] %v2523_v26  ;;  %v2535_v5 = vadd.f32 %v2532_v25, %v1921_v28  ;;  %v2468_v30 = vpop.f32.mrb[4].mxu1 }
 0x151   : > { %1960 = vst [vmem:[#allocation2 + $0x18] sm:$0xff] %v2529_v8  ;;  %v1181_v32 = vpop.f32.mrb[5].mxu1  ;;  %v2538_v35 = vadd.f32 %v2468_v30, %v269_v29 }
 0x152   : > { %1958 = vst [vmem:[#allocation2 + $0x8] sm:$0xff] %v2535_v5  ;;  %v2469_v36 = vpop.f32.mrb[6].mxu1  ;;  %v2544_v39 = vadd.f32 %v1181_v32, %v267_v31 }
 0x153   : > { %v1184_v40 = vpop.f32.mrb[7].mxu1  ;;  %v2550_v42 = vadd.f32 %v2469_v36, %v270_v34 }
 0x154   : > { %v2508_v41 = vpop.f32.mrb[4].mxu0  ;;  %v2556_v45 = vadd.f32 %v1184_v40, %v268_v37  ;;  %1968 = sbr.rel (%p2365_p2) target bundleno = 361 (0x169), region = 44 }
 0x155   : > { %v2541_v43 = vadd.f32 %v2538_v35, %v2508_v41  ;;  %v1934_v44 = vpop.f32.mrb[5].mxu0 }
 0x156   : > { %v2547_v46 = vadd.f32 %v2544_v39, %v1934_v44  ;;  %v2509_v47 = vpop.f32.mrb[6].mxu0  ;;  %v1971_v56 = vld [vmem:[#allocation2 + $0x10] sm:$0xff] (!%p2365_p2) }
 0x157   : > { %1963 = vst [vmem:[#allocation2 + $0x30] sm:$0xff] %v2541_v43  ;;  %v2553_v48 = vadd.f32 %v2550_v42, %v2509_v47  ;;  %v1937_v49 = vpop.f32.mrb[7].mxu0  ;;  %v1969_v51 = vld [vmem:[#allocation2] sm:$0xff] (!%p2365_p2)  ;;  %v1986_v59 = vmul.f32 (!%p2365_p2), %v2366_v52, %v1971_v56 }
 0x158   : > { %1961 = vst [vmem:[#allocation2 + $0x20] sm:$0xff] %v2547_v46  ;;  %v2559_v50 = vadd.f32 %v2556_v45, %v1937_v49  ;;  %v1984_v54 = vmul.f32 (!%p2365_p2), %v2366_v52, %v1969_v51  ;;  %v1972_v57 = vld [vmem:[#allocation2 + $0x18] sm:$0xff] (!%p2365_p2) }
 0x159   : > { %1964 = vst [vmem:[#allocation2 + $0x38] sm:$0xff] %v2553_v48  ;;  %v1970_v55 = vld [vmem:[#allocation2 + $0x8] sm:$0xff] (!%p2365_p2)  ;;  %v1987_v60 = vmul.f32 (!%p2365_p2), %v2366_v52, %v1972_v57  ;;  %v2001_v7 = vadd.f32 (!%p2365_p2), %v2367_v53, %v1986_v59 }
 0x15a   : > { %1962 = vst [vmem:[#allocation2 + $0x28] sm:$0xff] %v2559_v50  ;;  %v1985_v58 = vmul.f32 (!%p2365_p2), %v2366_v52, %v1970_v55  ;;  %v1999_v0 = vadd.f32 (!%p2365_p2), %v2367_v53, %v1984_v54 }
 0x15b   : > { %v2002_v9 = vadd.f32 %v2367_v53, %v1987_v60  ;;  %v2009_v16 = vmax.f32 %v2001_v7, 0.0 }
 0x15c   : > { %v2000_v6 = vadd.f32 %v2367_v53, %v1985_v58  ;;  %v2007_v11 = vmax.f32 %v1999_v0, 0.0 }
 0x15d   : > { %v2010_v17 = vmax.f32 %v2002_v9, 0.0  ;;  %2017 = vst [vmem:[%s2968_s28 + $0x10] sm:$0xff] %v2009_v16 }
 0x15e   : > { %v1975_v63 = vld [vmem:[#allocation2 + $0x30] sm:$0xff]  ;;  %v2008_v15 = vmax.f32 %v2000_v6, 0.0  ;;  %2015 = vst [vmem:[%s2968_s28] sm:$0xff] %v2007_v11 }
 0x15f   : > { %v1973_v61 = vld [vmem:[#allocation2 + $0x20] sm:$0xff]  ;;  %v1990_v3 = vmul.f32 %v2366_v52, %v1975_v63  ;;  %2018 = vst [vmem:[%s2968_s28 + $0x18] sm:$0xff] %v2010_v17 }
 0x160   : > { %v1988_v1 = vmul.f32 %v2366_v52, %v1973_v61  ;;  %v1976_v4 = vld [vmem:[#allocation2 + $0x38] sm:$0xff]  ;;  %2016 = vst [vmem:[%s2968_s28 + $0x8] sm:$0xff] %v2008_v15 }
 0x161   : > { %v1974_v62 = vld [vmem:[#allocation2 + $0x28] sm:$0xff]  ;;  %v1991_v10 = vmul.f32 %v2366_v52, %v1976_v4  ;;  %v2005_v14 = vadd.f32 %v2367_v53, %v1990_v3 }
 0x162   : > { %v1989_v2 = vmul.f32 %v2366_v52, %v1974_v62  ;;  %v2003_v12 = vadd.f32 %v2367_v53, %v1988_v1 }
 0x163   : > { %v2006_v18 = vadd.f32 %v2367_v53, %v1991_v10  ;;  %v2013_v20 = vmax.f32 %v2005_v14, 0.0 }
 0x164   : > { %v2004_v13 = vadd.f32 %v2367_v53, %v1989_v2  ;;  %v2011_v19 = vmax.f32 %v2003_v12, 0.0 }
 0x165   : > { %v2014_v21 = vmax.f32 %v2006_v18, 0.0  ;;  %2021 = vst [vmem:[%s2968_s28 + $0x30] sm:$0xff] %v2013_v20 }
 0x166   : > { %v2012_v33 = vmax.f32 %v2004_v13, 0.0  ;;  %2019 = vst [vmem:[%s2968_s28 + $0x20] sm:$0xff] %v2011_v19 }
 0x167   : > { %2022 = vst [vmem:[%s2968_s28 + $0x38] sm:$0xff] %v2014_v21 }
 0x168   : > { %2020 = vst [vmem:[%s2968_s28 + $0x28] sm:$0xff] %v2012_v33 }
 0x169 PF: > { %s2369_s18 = sshll.u32 %s2820_s19, 3  ;;  %s2370_s8 = sshll.u32 %s2824_s20, 6 }
 0x16a   : > { %s2039_s9 = sshll.u32 %s2968_s28, 4  ;;  %s2036_s12 = sadd.s32 %s2370_s8, %s2369_s18  ;;  %s3284_s9 = int_to_ptr.vmem [resolvable:$true] %s2039_s9 }
 0x16b   : > { %s2371_s13 = sshll.u32 %s2036_s12, 7  ;;  %s3293_s26 = scalar_lea.sflag [#allocation4], %s224_s11 }
 0x16c   : > { %s3289_s29 = scalar_lea.hbm %s3355_s4, %s2371_s13  ;;  %s2730_s6 = scalar_lea.vmem %s3284_s9, 1024 }
 0x16d   : > { %p2731_p3 = scmp.ne.s32.totalorder %s3284_s9, %s2730_s6  ;;  %s2843_s19 = smov [#allocation3]  }
 0x16e   : > { %s2734_s20 = sshll.u32 %s2843_s19, 4  ;;  %s2735_s20 = int_to_ptr.vmem [resolvable:$false] %s2734_s20 }
 0x16f   : > { %p2732_p4 = pnand %p2731_p3, %p2933_p6  ;;  %s2736_s28 = scalar_lea.vmem %s2735_s20, 2048 }
 0x170   : > { %p2737_p8 = scmp.lt.s32.totalorder %s3284_s9, %s2735_s20  ;;  %p2738_p9 = scmp.lt.s32.totalorder %s2736_s28, %s2730_s6 }
 0x171   : > { %p2733_p5 = pneg %p2732_p4 }
 0x172   : > { %p2739_p10 = por %p2738_p9, %p2737_p8 }
 0x174   : > { %p2740_p11 = pnand %p2739_p10, %p2733_p5 }
 0x176   : > { %2743 = shalt.err (!%p2740_p11)
}
 0x177   : > { %s2744_s11 = scalar_lea.hbm %s3289_s29, 1024  ;;  %s2748_s8 = scalar_lea.hbm %s3355_s4, 16384 }
 0x178   : > { %p2745_p12 = scmp.ne.s32.totalorder %s3289_s29, %s2744_s11  ;;  %p2749_p1 = scmp.lt.u32.totalorder %s3289_s29, %s3355_s4 }
 0x179   : > { %p2750_p2 = scmp.lt.u32.totalorder %s2748_s8, %s2744_s11  ;;  %p2752_p4 = scmp.lt.u32.totalorder %s2744_s11, %s3289_s29 }
 0x17a   : > { %p2746_p13 = pnand %p2745_p12, %p2933_p6 }
 0x17b   : > { %p2751_p3 = por %p2750_p2, %p2749_p1 }
 0x17c   : > { %p2747_p0 = pneg %p2746_p13 }
 0x17d   : > { %p2753_p5 = por %p2752_p4, %p2751_p3 }
 0x17f   : > { %p2754_p8 = pnand %p2753_p5, %p2747_p0 }
 0x181   : > { %2757 = shalt.err (!%p2754_p8)
}
 0x182   : > { %s2844_s14 = smov 128   ;;  %s2845_s25 = smov 8  }
 0x183   : > { %2628 = dma.vmem_to_hbm [thread:$0]  (%p2933_p6), %s3284_s9, 1024, %s3289_s29, %s3293_s26, %s2844_s14, %s2844_s14, %s2845_s25  }
 0x184 PF: > { %p2634_p9 = scmp.ge.s32.totalorder %s2840_s24, 2  ;;  %s2054_s6 = sand.u32 1, %s2804_s15  }
 0x185   : > { %s2055_s19 = scalar_lea.sflag [#allocation4], %s2054_s6 }
 0x186   : > { %p2631_p10 = pnand %p2634_p9, %p2940_p7 }
 0x188   : > { %2799 = dma.done.wait (!%p2631_p10), %s2055_s19, 1024  }
 0x189   : > { %2801 = vsyncadd (!%p2631_p10), %s2055_s19, 4294966272  ;;  %s17_s24 = sadd.s32 1, %s2840_s24   ;;  %s3366_s30 = sld [smem:[#allocation6_spill]] }
 0x18a   : > { %p14_p11 = scmp.ge.s32.totalorder %s17_s24, 50   ;;  %s3367_s9 = sld [smem:[#allocation7_spill]] }
 0x18b   : > { %s3368_s15 = smov %s2808_s16  ;;  %s3369_s16 = smov %s2812_s17 }
 0x18c   : > { %s3370_s17 = smov %s2954_s10  ;;  %s3371_s18 = smov %s2828_s21 }
 0x18d   : > { %s3372_s19 = smov %s2832_s22  ;;  %s3373_s20 = smov %s2836_s23 }
 0x18e   : > { %s3374_s21 = smov %s3378_s27  ;;  %16 = sbr.rel (!%p14_p11) target bundleno = 6 (0x6), region = 90 }
 0x18f   : > { %s3375_s22 = smov %s3366_s30 }
 0x190   : > { %s3376_s23 = smov %s3367_s9 }
 0x195   :  { %2060 = vsyncpa [#allocation4], 1 }
 0x196   :  { %2062 = vsyncpa [#allocation4 + $0x1], 1 }

</bundles_post_ra>
